<compile_context>
chip_gen: v7x
topology: tpu7x:2x2x1
jax: 0.10.0
libtpu: 0.0.40
codegen_flags: <defaults>
</compile_context>

<pallas_src>
import functools

import jax
import jax.numpy as jnp
import numpy as np
from jax.experimental import pallas as pl
from jax.experimental.pallas import tpu as pltpu


def residual_kernel(x_ref, w1_ref, b1_ref, w2_ref, b2_ref, xmask_ref,
                    o_ref, pad_ref, *, C, H, W, PADL):
    """Fused residual block for one sample.

    x_ref, o_ref : VMEM blocks (1, C, H*W)   -- lane-dense activations
    w*_ref       : VMEM (9, C, C) f32, [tap = ky*3+kx, c_out, c_in]
    b*_ref       : VMEM (C, 1) f32
    xmask_ref    : VMEM (2, H*W) f32 -- 0/1 column-validity masks for dx=-1 / dx=+1
    pad_ref      : VMEM scratch (C, PADL + H*W + PADL) f32, lane-aligned zero halo
    """
    f32 = jnp.float32
    eps = 1e-5                      # InstanceNorm2d default eps
    HW = H * W

    # Zero the lane-aligned halos once per grid step; both convs only rewrite the
    # [PADL, PADL+HW) interior, so the halos stay zero.  (Not guarded by
    # program_id==0 on purpose: under "parallel" semantics each core must do it.)
    pad_ref[:, 0:PADL] = jnp.zeros((C, PADL), f32)
    pad_ref[:, PADL + HW:PADL + HW + PADL] = jnp.zeros((C, PADL), f32)

    x = x_ref[0].astype(f32)        # (C, HW)
    mask_l = xmask_ref[0:1, :]      # (1, HW): lanes where x-1 is in range (dx = -1)
    mask_r = xmask_ref[1:2, :]      # (1, HW): lanes where x+1 is in range (dx = +1)

    offsets = [(dy, dx) for dy in (-1, 0, 1) for dx in (-1, 0, 1)]

    def conv3x3(img, w_ref, b_ref):
        # out[o, m] = b[o] + sum_{t, i} w[t, o, i] * shift_t(img)[i, m]
        pad_ref[:, PADL:PADL + HW] = img          # 128-aligned interior store
        acc = None
        for t, (dy, dx) in enumerate(offsets):
            s = dy * W + dx                       # flat shift; |s| <= W+1 <= PADL
            win = pad_ref[:, PADL + s:PADL + s + HW]   # (C, HW) shifted window
            if dx == -1:
                win = win * mask_l                # kill row-to-row bleed at x = 0
            elif dx == 1:
                win = win * mask_r                # kill row-to-row bleed at x = W-1
            d = jnp.dot(w_ref[t].astype(f32), win,     # MXU: (C, C) @ (C, HW)
                        preferred_element_type=f32,
                        precision=jax.lax.Precision.HIGHEST)
            acc = d if acc is None else acc + d
        return acc + b_ref[...].astype(f32)       # single bias broadcast per conv

    def inorm(y):
        # InstanceNorm2d, affine=False, biased variance; stats reduce along lanes.
        m = jnp.mean(y, axis=1, keepdims=True)
        d = y - m
        v = jnp.mean(d * d, axis=1, keepdims=True)
        return d * jax.lax.rsqrt(v + eps)

    y = jnp.maximum(inorm(conv3x3(x, w1_ref, b1_ref)), 0.0)   # ReLU(bn(conv1(X)))
    # TODO(synk): dropout path (use_dropout=True) not implemented; module is built with use_dropout=False.
    y = inorm(conv3x3(y, w2_ref, b2_ref))                     # bn(conv2(Y))
    o_ref[0] = jnp.maximum(y + x, 0.0).astype(o_ref.dtype)    # ReLU(Y + X)


def residual_forward(x, w1, b1, w2, b2):
    N, C, H, W = x.shape
    HW = H * W
    PADL = 128 * ((W + 1 + 127) // 128)        # lane-aligned halo, >= W+1

    # Host-side layout plumbing (free): lane-dense activations, tap-major weights.
    x_flat = x.reshape(N, C, HW)
    w1_t = jnp.transpose(w1, (2, 3, 0, 1)).reshape(9, C, C).astype(jnp.float32)
    w2_t = jnp.transpose(w2, (2, 3, 0, 1)).reshape(9, C, C).astype(jnp.float32)
    b1_c = b1.reshape(C, 1).astype(jnp.float32)
    b2_c = b2.reshape(C, 1).astype(jnp.float32)

    col = jnp.arange(HW, dtype=jnp.int32) % W
    xmask = jnp.stack([(col >= 1).astype(jnp.float32),        # dx = -1 reads x-1
                       (col <= W - 2).astype(jnp.float32)],   # dx = +1 reads x+1
                      axis=0)                                  # (2, HW)

    kernel = functools.partial(residual_kernel, C=C, H=H, W=W, PADL=PADL)

    grid_spec = pltpu.PrefetchScalarGridSpec(
        num_scalar_prefetch=0,
        grid=(N,),
        in_specs=[
            pl.BlockSpec((1, C, HW), lambda n: (n, 0, 0)),    # x (per-sample block)
            pl.BlockSpec((9, C, C), lambda n: (0, 0, 0)),     # w1 (VMEM, resident)
            pl.BlockSpec((C, 1), lambda n: (0, 0)),           # b1
            pl.BlockSpec((9, C, C), lambda n: (0, 0, 0)),     # w2
            pl.BlockSpec((C, 1), lambda n: (0, 0)),           # b2
            pl.BlockSpec((2, HW), lambda n: (0, 0)),          # column masks
        ],
        out_specs=pl.BlockSpec((1, C, HW), lambda n: (n, 0, 0)),
        scratch_shapes=[pltpu.VMEM((C, PADL + HW + PADL), jnp.float32)],
    )

    out_flat = pl.pallas_call(
        kernel,
        out_shape=jax.ShapeDtypeStruct((N, C, HW), x.dtype),
        grid_spec=grid_spec,
        compiler_params=pltpu.CompilerParams(
            dimension_semantics=("parallel",)),               # v7x: shard batch over 2 TCs
    )(x_flat, w1_t, b1_c, w2_t, b2_c, xmask)

    return out_flat.reshape(N, C, H, W)


def residual_reference(x, w1, b1, w2, b2):
    """Pure-JAX reference mirroring the PyTorch module exactly."""
    def conv(x, w, b):
        y = jax.lax.conv_general_dilated(
            x, w, window_strides=(1, 1), padding=((1, 1), (1, 1)),
            dimension_numbers=("NCHW", "OIHW", "NCHW"),
            precision=jax.lax.Precision.HIGHEST)
        return y + b[None, :, None, None]

    def inorm(y):
        m = y.mean(axis=(2, 3), keepdims=True)
        v = ((y - m) ** 2).mean(axis=(2, 3), keepdims=True)
        return (y - m) * jax.lax.rsqrt(v + 1e-5)

    y = jax.nn.relu(inorm(conv(x, w1, b1)))
    y = inorm(conv(y, w2, b2))
    return jax.nn.relu(y + x)


if __name__ == "__main__":
    N, C, H, W = 2, 4, 16, 16

    key = jax.random.PRNGKey(0)
    k_x, k_w1, k_b1, k_w2, k_b2 = jax.random.split(key, 5)

    x = jax.random.normal(k_x, (N, C, H, W), jnp.float32)
    w1 = jax.random.normal(k_w1, (C, C, 3, 3), jnp.float32) * 0.1
    b1 = jax.random.normal(k_b1, (C,), jnp.float32) * 0.1
    w2 = jax.random.normal(k_w2, (C, C, 3, 3), jnp.float32) * 0.1
    b2 = jax.random.normal(k_b2, (C,), jnp.float32) * 0.1

    out = residual_forward(x, w1, b1, w2, b2)
    out = jax.block_until_ready(out)

    ref = jax.block_until_ready(residual_reference(x, w1, b1, w2, b2))
    np.testing.assert_allclose(np.asarray(out), np.asarray(ref), rtol=2e-3, atol=2e-3)

    print("KERNEL_OK")
</pallas_src>

<mosaic_0001>
module attributes {stable_mosaic.version = 11 : i64} {
  func.func @residual_kernel(%arg0: i32, %arg1: memref<1x4x256xf32, #tpu.memory_space<vmem>>, %arg2: memref<9x4x4xf32, #tpu.memory_space<vmem>>, %arg3: memref<4x1xf32, #tpu.memory_space<vmem>>, %arg4: memref<9x4x4xf32, #tpu.memory_space<vmem>>, %arg5: memref<4x1xf32, #tpu.memory_space<vmem>>, %arg6: memref<2x256xf32, #tpu.memory_space<vmem>>, %arg7: memref<1x4x256xf32, #tpu.memory_space<vmem>>, %arg8: memref<4x512xf32, #tpu.memory_space<vmem>>) attributes {dimension_semantics = [#tpu.dimension_semantics<parallel>], iteration_bounds = array<i64: 2>, scalar_prefetch = 0 : i64, scratch_operands = 1 : i64, tpu.core_type = #tpu.core_type<tc>, window_params = [{transform_indices = @transform_0, window_bounds = array<i64: 1, 4, 256>}, {pipeline_mode = #tpu.pipeline_mode<synchronous>, transform_indices = @transform_1, window_bounds = array<i64: 9, 4, 4>}, {pipeline_mode = #tpu.pipeline_mode<synchronous>, transform_indices = @transform_2, window_bounds = array<i64: 4, 1>}, {pipeline_mode = #tpu.pipeline_mode<synchronous>, transform_indices = @transform_3, window_bounds = array<i64: 9, 4, 4>}, {pipeline_mode = #tpu.pipeline_mode<synchronous>, transform_indices = @transform_4, window_bounds = array<i64: 4, 1>}, {pipeline_mode = #tpu.pipeline_mode<synchronous>, transform_indices = @transform_5, window_bounds = array<i64: 2, 256>}, {transform_indices = @transform_6, window_bounds = array<i64: 1, 4, 256>}]} {
    %cst = arith.constant 0.000000e+00 : f32
    %0 = vector.broadcast %cst : f32 to vector<4x128xf32>
    %c0 = arith.constant 0 : index
    %c0_0 = arith.constant 0 : index
    %1 = vector.load %arg8[%c0, %c0_0] : memref<4x512xf32, #tpu.memory_space<vmem>>, vector<4x128xf32>
    tpu.vector_store %arg8[%c0, %c0_0], %0 {strides = array<i32>} : memref<4x512xf32, #tpu.memory_space<vmem>>, vector<4x128xf32>,
    %cst_1 = arith.constant 0.000000e+00 : f32
    %2 = vector.broadcast %cst_1 : f32 to vector<4x128xf32>
    %c0_2 = arith.constant 0 : index
    %c384 = arith.constant 384 : index
    %3 = vector.load %arg8[%c0_2, %c384] : memref<4x512xf32, #tpu.memory_space<vmem>>, vector<4x128xf32>
    tpu.vector_store %arg8[%c0_2, %c384], %2 {strides = array<i32>} : memref<4x512xf32, #tpu.memory_space<vmem>>, vector<4x128xf32>,
    %c0_3 = arith.constant 0 : index
    %c0_4 = arith.constant 0 : index
    %c0_5 = arith.constant 0 : index
    %4 = vector.load %arg1[%c0_3, %c0_4, %c0_5] : memref<1x4x256xf32, #tpu.memory_space<vmem>>, vector<1x4x256xf32>
    %5 = vector.shape_cast %4 : vector<1x4x256xf32> to vector<4x256xf32>
    %c0_6 = arith.constant 0 : index
    %c0_7 = arith.constant 0 : index
    %6 = vector.load %arg6[%c0_6, %c0_7] : memref<2x256xf32, #tpu.memory_space<vmem>>, vector<1x256xf32>
    %c1 = arith.constant 1 : index
    %c0_8 = arith.constant 0 : index
    %7 = vector.load %arg6[%c1, %c0_8] : memref<2x256xf32, #tpu.memory_space<vmem>>, vector<1x256xf32>
    %c0_9 = arith.constant 0 : index
    %c128 = arith.constant 128 : index
    %8 = vector.load %arg8[%c0_9, %c128] : memref<4x512xf32, #tpu.memory_space<vmem>>, vector<4x256xf32>
    tpu.vector_store %arg8[%c0_9, %c128], %5 {strides = array<i32>} : memref<4x512xf32, #tpu.memory_space<vmem>>, vector<4x256xf32>,
    %c0_10 = arith.constant 0 : index
    %c111 = arith.constant 111 : index
    %9 = vector.load %arg8[%c0_10, %c111] : memref<4x512xf32, #tpu.memory_space<vmem>>, vector<4x256xf32>
    %10 = vector.broadcast %6 : vector<1x256xf32> to vector<4x256xf32>
    %11 = arith.mulf %9, %10 : vector<4x256xf32>
    %c0_11 = arith.constant 0 : index
    %c0_12 = arith.constant 0 : index
    %c0_13 = arith.constant 0 : index
    %12 = vector.load %arg2[%c0_11, %c0_12, %c0_13] : memref<9x4x4xf32, #tpu.memory_space<vmem>>, vector<1x4x4xf32>
    %13 = vector.shape_cast %12 : vector<1x4x4xf32> to vector<4x4xf32>
    %cst_14 = arith.constant dense<0.000000e+00> : vector<4x256xf32>
    %14 = tpu.matmul %13, %11, %cst_14 {dimension_numbers = #tpu.dot_dimension_numbers<[1], [0], [0], [1], [0, 0, 1, 1], [], []>, precision = #tpu.contract_precision<fp32>} : vector<4x4xf32>, vector<4x256xf32>, vector<4x256xf32> -> vector<4x256xf32>
    %c0_15 = arith.constant 0 : index
    %c112 = arith.constant 112 : index
    %15 = vector.load %arg8[%c0_15, %c112] : memref<4x512xf32, #tpu.memory_space<vmem>>, vector<4x256xf32>
    %c1_16 = arith.constant 1 : index
    %c0_17 = arith.constant 0 : index
    %c0_18 = arith.constant 0 : index
    %16 = vector.load %arg2[%c1_16, %c0_17, %c0_18] : memref<9x4x4xf32, #tpu.memory_space<vmem>>, vector<1x4x4xf32>
    %17 = vector.shape_cast %16 : vector<1x4x4xf32> to vector<4x4xf32>
    %cst_19 = arith.constant dense<0.000000e+00> : vector<4x256xf32>
    %18 = tpu.matmul %17, %15, %cst_19 {dimension_numbers = #tpu.dot_dimension_numbers<[1], [0], [0], [1], [0, 0, 1, 1], [], []>, precision = #tpu.contract_precision<fp32>} : vector<4x4xf32>, vector<4x256xf32>, vector<4x256xf32> -> vector<4x256xf32>
    %19 = arith.addf %14, %18 : vector<4x256xf32>
    %c0_20 = arith.constant 0 : index
    %c113 = arith.constant 113 : index
    %20 = vector.load %arg8[%c0_20, %c113] : memref<4x512xf32, #tpu.memory_space<vmem>>, vector<4x256xf32>
    %21 = vector.broadcast %7 : vector<1x256xf32> to vector<4x256xf32>
    %22 = arith.mulf %20, %21 : vector<4x256xf32>
    %c2 = arith.constant 2 : index
    %c0_21 = arith.constant 0 : index
    %c0_22 = arith.constant 0 : index
    %23 = vector.load %arg2[%c2, %c0_21, %c0_22] : memref<9x4x4xf32, #tpu.memory_space<vmem>>, vector<1x4x4xf32>
    %24 = vector.shape_cast %23 : vector<1x4x4xf32> to vector<4x4xf32>
    %cst_23 = arith.constant dense<0.000000e+00> : vector<4x256xf32>
    %25 = tpu.matmul %24, %22, %cst_23 {dimension_numbers = #tpu.dot_dimension_numbers<[1], [0], [0], [1], [0, 0, 1, 1], [], []>, precision = #tpu.contract_precision<fp32>} : vector<4x4xf32>, vector<4x256xf32>, vector<4x256xf32> -> vector<4x256xf32>
    %26 = arith.addf %19, %25 : vector<4x256xf32>
    %c0_24 = arith.constant 0 : index
    %c127 = arith.constant 127 : index
    %27 = vector.load %arg8[%c0_24, %c127] : memref<4x512xf32, #tpu.memory_space<vmem>>, vector<4x256xf32>
    %28 = vector.broadcast %6 : vector<1x256xf32> to vector<4x256xf32>
    %29 = arith.mulf %27, %28 : vector<4x256xf32>
    %c3 = arith.constant 3 : index
    %c0_25 = arith.constant 0 : index
    %c0_26 = arith.constant 0 : index
    %30 = vector.load %arg2[%c3, %c0_25, %c0_26] : memref<9x4x4xf32, #tpu.memory_space<vmem>>, vector<1x4x4xf32>
    %31 = vector.shape_cast %30 : vector<1x4x4xf32> to vector<4x4xf32>
    %cst_27 = arith.constant dense<0.000000e+00> : vector<4x256xf32>
    %32 = tpu.matmul %31, %29, %cst_27 {dimension_numbers = #tpu.dot_dimension_numbers<[1], [0], [0], [1], [0, 0, 1, 1], [], []>, precision = #tpu.contract_precision<fp32>} : vector<4x4xf32>, vector<4x256xf32>, vector<4x256xf32> -> vector<4x256xf32>
    %33 = arith.addf %26, %32 : vector<4x256xf32>
    %c0_28 = arith.constant 0 : index
    %c128_29 = arith.constant 128 : index
    %34 = vector.load %arg8[%c0_28, %c128_29] : memref<4x512xf32, #tpu.memory_space<vmem>>, vector<4x256xf32>
    %c4 = arith.constant 4 : index
    %c0_30 = arith.constant 0 : index
    %c0_31 = arith.constant 0 : index
    %35 = vector.load %arg2[%c4, %c0_30, %c0_31] : memref<9x4x4xf32, #tpu.memory_space<vmem>>, vector<1x4x4xf32>
    %36 = vector.shape_cast %35 : vector<1x4x4xf32> to vector<4x4xf32>
    %cst_32 = arith.constant dense<0.000000e+00> : vector<4x256xf32>
    %37 = tpu.matmul %36, %34, %cst_32 {dimension_numbers = #tpu.dot_dimension_numbers<[1], [0], [0], [1], [0, 0, 1, 1], [], []>, precision = #tpu.contract_precision<fp32>} : vector<4x4xf32>, vector<4x256xf32>, vector<4x256xf32> -> vector<4x256xf32>
    %38 = arith.addf %33, %37 : vector<4x256xf32>
    %c0_33 = arith.constant 0 : index
    %c129 = arith.constant 129 : index
    %39 = vector.load %arg8[%c0_33, %c129] : memref<4x512xf32, #tpu.memory_space<vmem>>, vector<4x256xf32>
    %40 = vector.broadcast %7 : vector<1x256xf32> to vector<4x256xf32>
    %41 = arith.mulf %39, %40 : vector<4x256xf32>
    %c5 = arith.constant 5 : index
    %c0_34 = arith.constant 0 : index
    %c0_35 = arith.constant 0 : index
    %42 = vector.load %arg2[%c5, %c0_34, %c0_35] : memref<9x4x4xf32, #tpu.memory_space<vmem>>, vector<1x4x4xf32>
    %43 = vector.shape_cast %42 : vector<1x4x4xf32> to vector<4x4xf32>
    %cst_36 = arith.constant dense<0.000000e+00> : vector<4x256xf32>
    %44 = tpu.matmul %43, %41, %cst_36 {dimension_numbers = #tpu.dot_dimension_numbers<[1], [0], [0], [1], [0, 0, 1, 1], [], []>, precision = #tpu.contract_precision<fp32>} : vector<4x4xf32>, vector<4x256xf32>, vector<4x256xf32> -> vector<4x256xf32>
    %45 = arith.addf %38, %44 : vector<4x256xf32>
    %c0_37 = arith.constant 0 : index
    %c143 = arith.constant 143 : index
    %46 = vector.load %arg8[%c0_37, %c143] : memref<4x512xf32, #tpu.memory_space<vmem>>, vector<4x256xf32>
    %47 = vector.broadcast %6 : vector<1x256xf32> to vector<4x256xf32>
    %48 = arith.mulf %46, %47 : vector<4x256xf32>
    %c6 = arith.constant 6 : index
    %c0_38 = arith.constant 0 : index
    %c0_39 = arith.constant 0 : index
    %49 = vector.load %arg2[%c6, %c0_38, %c0_39] : memref<9x4x4xf32, #tpu.memory_space<vmem>>, vector<1x4x4xf32>
    %50 = vector.shape_cast %49 : vector<1x4x4xf32> to vector<4x4xf32>
    %cst_40 = arith.constant dense<0.000000e+00> : vector<4x256xf32>
    %51 = tpu.matmul %50, %48, %cst_40 {dimension_numbers = #tpu.dot_dimension_numbers<[1], [0], [0], [1], [0, 0, 1, 1], [], []>, precision = #tpu.contract_precision<fp32>} : vector<4x4xf32>, vector<4x256xf32>, vector<4x256xf32> -> vector<4x256xf32>
    %52 = arith.addf %45, %51 : vector<4x256xf32>
    %c0_41 = arith.constant 0 : index
    %c144 = arith.constant 144 : index
    %53 = vector.load %arg8[%c0_41, %c144] : memref<4x512xf32, #tpu.memory_space<vmem>>, vector<4x256xf32>
    %c7 = arith.constant 7 : index
    %c0_42 = arith.constant 0 : index
    %c0_43 = arith.constant 0 : index
    %54 = vector.load %arg2[%c7, %c0_42, %c0_43] : memref<9x4x4xf32, #tpu.memory_space<vmem>>, vector<1x4x4xf32>
    %55 = vector.shape_cast %54 : vector<1x4x4xf32> to vector<4x4xf32>
    %cst_44 = arith.constant dense<0.000000e+00> : vector<4x256xf32>
    %56 = tpu.matmul %55, %53, %cst_44 {dimension_numbers = #tpu.dot_dimension_numbers<[1], [0], [0], [1], [0, 0, 1, 1], [], []>, precision = #tpu.contract_precision<fp32>} : vector<4x4xf32>, vector<4x256xf32>, vector<4x256xf32> -> vector<4x256xf32>
    %57 = arith.addf %52, %56 : vector<4x256xf32>
    %c0_45 = arith.constant 0 : index
    %c145 = arith.constant 145 : index
    %58 = vector.load %arg8[%c0_45, %c145] : memref<4x512xf32, #tpu.memory_space<vmem>>, vector<4x256xf32>
    %59 = vector.broadcast %7 : vector<1x256xf32> to vector<4x256xf32>
    %60 = arith.mulf %58, %59 : vector<4x256xf32>
    %c8 = arith.constant 8 : index
    %c0_46 = arith.constant 0 : index
    %c0_47 = arith.constant 0 : index
    %61 = vector.load %arg2[%c8, %c0_46, %c0_47] : memref<9x4x4xf32, #tpu.memory_space<vmem>>, vector<1x4x4xf32>
    %62 = vector.shape_cast %61 : vector<1x4x4xf32> to vector<4x4xf32>
    %cst_48 = arith.constant dense<0.000000e+00> : vector<4x256xf32>
    %63 = tpu.matmul %62, %60, %cst_48 {dimension_numbers = #tpu.dot_dimension_numbers<[1], [0], [0], [1], [0, 0, 1, 1], [], []>, precision = #tpu.contract_precision<fp32>} : vector<4x4xf32>, vector<4x256xf32>, vector<4x256xf32> -> vector<4x256xf32>
    %64 = arith.addf %57, %63 : vector<4x256xf32>
    %c0_49 = arith.constant 0 : index
    %c0_50 = arith.constant 0 : index
    %65 = vector.load %arg3[%c0_49, %c0_50] : memref<4x1xf32, #tpu.memory_space<vmem>>, vector<4x1xf32>
    %66 = vector.broadcast %65 : vector<4x1xf32> to vector<4x256xf32>
    %67 = arith.addf %64, %66 : vector<4x256xf32>
    %cst_51 = arith.constant dense<0.000000e+00> : vector<4xf32>
    %68 = vector.multi_reduction <add>, %67, %cst_51 [1] : vector<4x256xf32> to vector<4xf32>
    %69 = vector.shape_cast %68 : vector<4xf32> to vector<4x1xf32>
    %cst_52 = arith.constant 2.560000e+02 : f32
    %70 = vector.broadcast %cst_52 : f32 to vector<4x1xf32>
    %71 = arith.divf %69, %70 : vector<4x1xf32>
    %72 = vector.broadcast %71 : vector<4x1xf32> to vector<4x256xf32>
    %73 = arith.subf %67, %72 : vector<4x256xf32>
    %74 = arith.mulf %73, %73 : vector<4x256xf32>
    %cst_53 = arith.constant dense<0.000000e+00> : vector<4xf32>
    %75 = vector.multi_reduction <add>, %74, %cst_53 [1] : vector<4x256xf32> to vector<4xf32>
    %76 = vector.shape_cast %75 : vector<4xf32> to vector<4x1xf32>
    %cst_54 = arith.constant 2.560000e+02 : f32
    %77 = vector.broadcast %cst_54 : f32 to vector<4x1xf32>
    %78 = arith.divf %76, %77 : vector<4x1xf32>
    %cst_55 = arith.constant 9.99999974E-6 : f32
    %79 = vector.broadcast %cst_55 : f32 to vector<4x1xf32>
    %80 = arith.addf %78, %79 : vector<4x1xf32>
    %81 = math.rsqrt %80 : vector<4x1xf32>
    %82 = vector.broadcast %81 : vector<4x1xf32> to vector<4x256xf32>
    %83 = arith.mulf %73, %82 : vector<4x256xf32>
    %cst_56 = arith.constant 0.000000e+00 : f32
    %84 = vector.broadcast %cst_56 : f32 to vector<4x256xf32>
    %85 = arith.maximumf %83, %84 : vector<4x256xf32>
    %c0_57 = arith.constant 0 : index
    %c128_58 = arith.constant 128 : index
    %86 = vector.load %arg8[%c0_57, %c128_58] : memref<4x512xf32, #tpu.memory_space<vmem>>, vector<4x256xf32>
    tpu.vector_store %arg8[%c0_57, %c128_58], %85 {strides = array<i32>} : memref<4x512xf32, #tpu.memory_space<vmem>>, vector<4x256xf32>,
    %c0_59 = arith.constant 0 : index
    %c111_60 = arith.constant 111 : index
    %87 = vector.load %arg8[%c0_59, %c111_60] : memref<4x512xf32, #tpu.memory_space<vmem>>, vector<4x256xf32>
    %88 = vector.broadcast %6 : vector<1x256xf32> to vector<4x256xf32>
    %89 = arith.mulf %87, %88 : vector<4x256xf32>
    %c0_61 = arith.constant 0 : index
    %c0_62 = arith.constant 0 : index
    %c0_63 = arith.constant 0 : index
    %90 = vector.load %arg4[%c0_61, %c0_62, %c0_63] : memref<9x4x4xf32, #tpu.memory_space<vmem>>, vector<1x4x4xf32>
    %91 = vector.shape_cast %90 : vector<1x4x4xf32> to vector<4x4xf32>
    %cst_64 = arith.constant dense<0.000000e+00> : vector<4x256xf32>
    %92 = tpu.matmul %91, %89, %cst_64 {dimension_numbers = #tpu.dot_dimension_numbers<[1], [0], [0], [1], [0, 0, 1, 1], [], []>, precision = #tpu.contract_precision<fp32>} : vector<4x4xf32>, vector<4x256xf32>, vector<4x256xf32> -> vector<4x256xf32>
    %c0_65 = arith.constant 0 : index
    %c112_66 = arith.constant 112 : index
    %93 = vector.load %arg8[%c0_65, %c112_66] : memref<4x512xf32, #tpu.memory_space<vmem>>, vector<4x256xf32>
    %c1_67 = arith.constant 1 : index
    %c0_68 = arith.constant 0 : index
    %c0_69 = arith.constant 0 : index
    %94 = vector.load %arg4[%c1_67, %c0_68, %c0_69] : memref<9x4x4xf32, #tpu.memory_space<vmem>>, vector<1x4x4xf32>
    %95 = vector.shape_cast %94 : vector<1x4x4xf32> to vector<4x4xf32>
    %cst_70 = arith.constant dense<0.000000e+00> : vector<4x256xf32>
    %96 = tpu.matmul %95, %93, %cst_70 {dimension_numbers = #tpu.dot_dimension_numbers<[1], [0], [0], [1], [0, 0, 1, 1], [], []>, precision = #tpu.contract_precision<fp32>} : vector<4x4xf32>, vector<4x256xf32>, vector<4x256xf32> -> vector<4x256xf32>
    %97 = arith.addf %92, %96 : vector<4x256xf32>
    %c0_71 = arith.constant 0 : index
    %c113_72 = arith.constant 113 : index
    %98 = vector.load %arg8[%c0_71, %c113_72] : memref<4x512xf32, #tpu.memory_space<vmem>>, vector<4x256xf32>
    %99 = vector.broadcast %7 : vector<1x256xf32> to vector<4x256xf32>
    %100 = arith.mulf %98, %99 : vector<4x256xf32>
    %c2_73 = arith.constant 2 : index
    %c0_74 = arith.constant 0 : index
    %c0_75 = arith.constant 0 : index
    %101 = vector.load %arg4[%c2_73, %c0_74, %c0_75] : memref<9x4x4xf32, #tpu.memory_space<vmem>>, vector<1x4x4xf32>
    %102 = vector.shape_cast %101 : vector<1x4x4xf32> to vector<4x4xf32>
    %cst_76 = arith.constant dense<0.000000e+00> : vector<4x256xf32>
    %103 = tpu.matmul %102, %100, %cst_76 {dimension_numbers = #tpu.dot_dimension_numbers<[1], [0], [0], [1], [0, 0, 1, 1], [], []>, precision = #tpu.contract_precision<fp32>} : vector<4x4xf32>, vector<4x256xf32>, vector<4x256xf32> -> vector<4x256xf32>
    %104 = arith.addf %97, %103 : vector<4x256xf32>
    %c0_77 = arith.constant 0 : index
    %c127_78 = arith.constant 127 : index
    %105 = vector.load %arg8[%c0_77, %c127_78] : memref<4x512xf32, #tpu.memory_space<vmem>>, vector<4x256xf32>
    %106 = vector.broadcast %6 : vector<1x256xf32> to vector<4x256xf32>
    %107 = arith.mulf %105, %106 : vector<4x256xf32>
    %c3_79 = arith.constant 3 : index
    %c0_80 = arith.constant 0 : index
    %c0_81 = arith.constant 0 : index
    %108 = vector.load %arg4[%c3_79, %c0_80, %c0_81] : memref<9x4x4xf32, #tpu.memory_space<vmem>>, vector<1x4x4xf32>
    %109 = vector.shape_cast %108 : vector<1x4x4xf32> to vector<4x4xf32>
    %cst_82 = arith.constant dense<0.000000e+00> : vector<4x256xf32>
    %110 = tpu.matmul %109, %107, %cst_82 {dimension_numbers = #tpu.dot_dimension_numbers<[1], [0], [0], [1], [0, 0, 1, 1], [], []>, precision = #tpu.contract_precision<fp32>} : vector<4x4xf32>, vector<4x256xf32>, vector<4x256xf32> -> vector<4x256xf32>
    %111 = arith.addf %104, %110 : vector<4x256xf32>
    %c0_83 = arith.constant 0 : index
    %c128_84 = arith.constant 128 : index
    %112 = vector.load %arg8[%c0_83, %c128_84] : memref<4x512xf32, #tpu.memory_space<vmem>>, vector<4x256xf32>
    %c4_85 = arith.constant 4 : index
    %c0_86 = arith.constant 0 : index
    %c0_87 = arith.constant 0 : index
    %113 = vector.load %arg4[%c4_85, %c0_86, %c0_87] : memref<9x4x4xf32, #tpu.memory_space<vmem>>, vector<1x4x4xf32>
    %114 = vector.shape_cast %113 : vector<1x4x4xf32> to vector<4x4xf32>
    %cst_88 = arith.constant dense<0.000000e+00> : vector<4x256xf32>
    %115 = tpu.matmul %114, %112, %cst_88 {dimension_numbers = #tpu.dot_dimension_numbers<[1], [0], [0], [1], [0, 0, 1, 1], [], []>, precision = #tpu.contract_precision<fp32>} : vector<4x4xf32>, vector<4x256xf32>, vector<4x256xf32> -> vector<4x256xf32>
    %116 = arith.addf %111, %115 : vector<4x256xf32>
    %c0_89 = arith.constant 0 : index
    %c129_90 = arith.constant 129 : index
    %117 = vector.load %arg8[%c0_89, %c129_90] : memref<4x512xf32, #tpu.memory_space<vmem>>, vector<4x256xf32>
    %118 = vector.broadcast %7 : vector<1x256xf32> to vector<4x256xf32>
    %119 = arith.mulf %117, %118 : vector<4x256xf32>
    %c5_91 = arith.constant 5 : index
    %c0_92 = arith.constant 0 : index
    %c0_93 = arith.constant 0 : index
    %120 = vector.load %arg4[%c5_91, %c0_92, %c0_93] : memref<9x4x4xf32, #tpu.memory_space<vmem>>, vector<1x4x4xf32>
    %121 = vector.shape_cast %120 : vector<1x4x4xf32> to vector<4x4xf32>
    %cst_94 = arith.constant dense<0.000000e+00> : vector<4x256xf32>
    %122 = tpu.matmul %121, %119, %cst_94 {dimension_numbers = #tpu.dot_dimension_numbers<[1], [0], [0], [1], [0, 0, 1, 1], [], []>, precision = #tpu.contract_precision<fp32>} : vector<4x4xf32>, vector<4x256xf32>, vector<4x256xf32> -> vector<4x256xf32>
    %123 = arith.addf %116, %122 : vector<4x256xf32>
    %c0_95 = arith.constant 0 : index
    %c143_96 = arith.constant 143 : index
    %124 = vector.load %arg8[%c0_95, %c143_96] : memref<4x512xf32, #tpu.memory_space<vmem>>, vector<4x256xf32>
    %125 = vector.broadcast %6 : vector<1x256xf32> to vector<4x256xf32>
    %126 = arith.mulf %124, %125 : vector<4x256xf32>
    %c6_97 = arith.constant 6 : index
    %c0_98 = arith.constant 0 : index
    %c0_99 = arith.constant 0 : index
    %127 = vector.load %arg4[%c6_97, %c0_98, %c0_99] : memref<9x4x4xf32, #tpu.memory_space<vmem>>, vector<1x4x4xf32>
    %128 = vector.shape_cast %127 : vector<1x4x4xf32> to vector<4x4xf32>
    %cst_100 = arith.constant dense<0.000000e+00> : vector<4x256xf32>
    %129 = tpu.matmul %128, %126, %cst_100 {dimension_numbers = #tpu.dot_dimension_numbers<[1], [0], [0], [1], [0, 0, 1, 1], [], []>, precision = #tpu.contract_precision<fp32>} : vector<4x4xf32>, vector<4x256xf32>, vector<4x256xf32> -> vector<4x256xf32>
    %130 = arith.addf %123, %129 : vector<4x256xf32>
    %c0_101 = arith.constant 0 : index
    %c144_102 = arith.constant 144 : index
    %131 = vector.load %arg8[%c0_101, %c144_102] : memref<4x512xf32, #tpu.memory_space<vmem>>, vector<4x256xf32>
    %c7_103 = arith.constant 7 : index
    %c0_104 = arith.constant 0 : index
    %c0_105 = arith.constant 0 : index
    %132 = vector.load %arg4[%c7_103, %c0_104, %c0_105] : memref<9x4x4xf32, #tpu.memory_space<vmem>>, vector<1x4x4xf32>
    %133 = vector.shape_cast %132 : vector<1x4x4xf32> to vector<4x4xf32>
    %cst_106 = arith.constant dense<0.000000e+00> : vector<4x256xf32>
    %134 = tpu.matmul %133, %131, %cst_106 {dimension_numbers = #tpu.dot_dimension_numbers<[1], [0], [0], [1], [0, 0, 1, 1], [], []>, precision = #tpu.contract_precision<fp32>} : vector<4x4xf32>, vector<4x256xf32>, vector<4x256xf32> -> vector<4x256xf32>
    %135 = arith.addf %130, %134 : vector<4x256xf32>
    %c0_107 = arith.constant 0 : index
    %c145_108 = arith.constant 145 : index
    %136 = vector.load %arg8[%c0_107, %c145_108] : memref<4x512xf32, #tpu.memory_space<vmem>>, vector<4x256xf32>
    %137 = vector.broadcast %7 : vector<1x256xf32> to vector<4x256xf32>
    %138 = arith.mulf %136, %137 : vector<4x256xf32>
    %c8_109 = arith.constant 8 : index
    %c0_110 = arith.constant 0 : index
    %c0_111 = arith.constant 0 : index
    %139 = vector.load %arg4[%c8_109, %c0_110, %c0_111] : memref<9x4x4xf32, #tpu.memory_space<vmem>>, vector<1x4x4xf32>
    %140 = vector.shape_cast %139 : vector<1x4x4xf32> to vector<4x4xf32>
    %cst_112 = arith.constant dense<0.000000e+00> : vector<4x256xf32>
    %141 = tpu.matmul %140, %138, %cst_112 {dimension_numbers = #tpu.dot_dimension_numbers<[1], [0], [0], [1], [0, 0, 1, 1], [], []>, precision = #tpu.contract_precision<fp32>} : vector<4x4xf32>, vector<4x256xf32>, vector<4x256xf32> -> vector<4x256xf32>
    %142 = arith.addf %135, %141 : vector<4x256xf32>
    %c0_113 = arith.constant 0 : index
    %c0_114 = arith.constant 0 : index
    %143 = vector.load %arg5[%c0_113, %c0_114] : memref<4x1xf32, #tpu.memory_space<vmem>>, vector<4x1xf32>
    %144 = vector.broadcast %143 : vector<4x1xf32> to vector<4x256xf32>
    %145 = arith.addf %142, %144 : vector<4x256xf32>
    %cst_115 = arith.constant dense<0.000000e+00> : vector<4xf32>
    %146 = vector.multi_reduction <add>, %145, %cst_115 [1] : vector<4x256xf32> to vector<4xf32>
    %147 = vector.shape_cast %146 : vector<4xf32> to vector<4x1xf32>
    %cst_116 = arith.constant 2.560000e+02 : f32
    %148 = vector.broadcast %cst_116 : f32 to vector<4x1xf32>
    %149 = arith.divf %147, %148 : vector<4x1xf32>
    %150 = vector.broadcast %149 : vector<4x1xf32> to vector<4x256xf32>
    %151 = arith.subf %145, %150 : vector<4x256xf32>
    %152 = arith.mulf %151, %151 : vector<4x256xf32>
    %cst_117 = arith.constant dense<0.000000e+00> : vector<4xf32>
    %153 = vector.multi_reduction <add>, %152, %cst_117 [1] : vector<4x256xf32> to vector<4xf32>
    %154 = vector.shape_cast %153 : vector<4xf32> to vector<4x1xf32>
    %cst_118 = arith.constant 2.560000e+02 : f32
    %155 = vector.broadcast %cst_118 : f32 to vector<4x1xf32>
    %156 = arith.divf %154, %155 : vector<4x1xf32>
    %cst_119 = arith.constant 9.99999974E-6 : f32
    %157 = vector.broadcast %cst_119 : f32 to vector<4x1xf32>
    %158 = arith.addf %156, %157 : vector<4x1xf32>
    %159 = math.rsqrt %158 : vector<4x1xf32>
    %160 = vector.broadcast %159 : vector<4x1xf32> to vector<4x256xf32>
    %161 = arith.mulf %151, %160 : vector<4x256xf32>
    %162 = arith.addf %161, %5 : vector<4x256xf32>
    %cst_120 = arith.constant 0.000000e+00 : f32
    %163 = vector.broadcast %cst_120 : f32 to vector<4x256xf32>
    %164 = arith.maximumf %162, %163 : vector<4x256xf32>
    %c0_121 = arith.constant 0 : index
    %c0_122 = arith.constant 0 : index
    %c0_123 = arith.constant 0 : index
    %165 = vector.load %arg7[%c0_121, %c0_122, %c0_123] : memref<1x4x256xf32, #tpu.memory_space<vmem>>, vector<1x4x256xf32>
    %166 = vector.shape_cast %165 : vector<1x4x256xf32> to vector<4x256xf32>
    %167 = vector.shape_cast %164 : vector<4x256xf32> to vector<1x4x256xf32>
    tpu.vector_store %arg7[%c0_121, %c0_122, %c0_123], %167 {strides = array<i32>} : memref<1x4x256xf32, #tpu.memory_space<vmem>>, vector<1x4x256xf32>,
    return
  }
  func.func @transform_0(%arg0: i32) -> (i32, i32, i32) {
    %c0_i32 = arith.constant 0 : i32
    %c0_i32_0 = arith.constant 0 : i32
    %c0_i32_1 = arith.constant 0 : i32
    return %arg0, %c0_i32, %c0_i32_0 : i32, i32, i32
  }
  func.func @transform_1(%arg0: i32) -> (i32, i32, i32) {
    %c0_i32 = arith.constant 0 : i32
    %c0_i32_0 = arith.constant 0 : i32
    %c0_i32_1 = arith.constant 0 : i32
    %c0_i32_2 = arith.constant 0 : i32
    return %c0_i32, %c0_i32_0, %c0_i32_1 : i32, i32, i32
  }
  func.func @transform_2(%arg0: i32) -> (i32, i32) {
    %c0_i32 = arith.constant 0 : i32
    %c0_i32_0 = arith.constant 0 : i32
    %c0_i32_1 = arith.constant 0 : i32
    return %c0_i32, %c0_i32_0 : i32, i32
  }
  func.func @transform_3(%arg0: i32) -> (i32, i32, i32) {
    %c0_i32 = arith.constant 0 : i32
    %c0_i32_0 = arith.constant 0 : i32
    %c0_i32_1 = arith.constant 0 : i32
    %c0_i32_2 = arith.constant 0 : i32
    return %c0_i32, %c0_i32_0, %c0_i32_1 : i32, i32, i32
  }
  func.func @transform_4(%arg0: i32) -> (i32, i32) {
    %c0_i32 = arith.constant 0 : i32
    %c0_i32_0 = arith.constant 0 : i32
    %c0_i32_1 = arith.constant 0 : i32
    return %c0_i32, %c0_i32_0 : i32, i32
  }
  func.func @transform_5(%arg0: i32) -> (i32, i32) {
    %c0_i32 = arith.constant 0 : i32
    %c0_i32_0 = arith.constant 0 : i32
    %c0_i32_1 = arith.constant 0 : i32
    return %c0_i32, %c0_i32_0 : i32, i32
  }
  func.func @transform_6(%arg0: i32) -> (i32, i32, i32) {
    %c0_i32 = arith.constant 0 : i32
    %c0_i32_0 = arith.constant 0 : i32
    %c0_i32_1 = arith.constant 0 : i32
    return %arg0, %c0_i32, %c0_i32_0 : i32, i32, i32
  }
}

</mosaic_0001>

<bundles_post_ra>
// kernel: tpu_custom_call.1
= control target key start
LH: loop header
LB: loop body
LE: loop exit
PB: predicated region body
PF: predicated region fallthrough
CT: control target
= control target key end

     0   :  { %11 = vsyncpa [#allocation4], 0  ;;  %s10257_s0 = inlined_call_operand.vmem [shape: f32[2,4,256], index: 0, kind: input, shape index: {}]   ;;  %s10258_s1 = inlined_call_operand.vmem [shape: f32[9,4,4], index: 1, kind: input, shape index: {}]   ;;  %s10259_s2 = inlined_call_operand.vmem [shape: f32[4,1], index: 2, kind: input, shape index: {}]   ;;  %s10260_s3 = inlined_call_operand.vmem [shape: f32[9,4,4], index: 3, kind: input, shape index: {}]   ;;  %s10261_s4 = inlined_call_operand.vmem [shape: f32[4,1], index: 4, kind: input, shape index: {}]   ;;  %s10262_s5 = inlined_call_operand.vmem [shape: f32[2,256], index: 5, kind: input, shape index: {}]   ;;  %s10263_s6 = inlined_call_operand.hbm [shape: f32[2,4,256], index: 6, kind: output, shape index: {}]  }
   0x1   :  { %13 = vsyncpa [#allocation4 + $0x1], 0  ;;  %s9677_s21 = smov 0   ;;  %s9679_s22 = smov 0  }
   0x2   :  { %s9681_s23 = smov 0   ;;  %s9683_s24 = smov 0  }
   0x3 LB: > { %s9698_s25 = sadd.s32 4294967295, %s9629_s24   ;;  %s9265_s26 = sadd.s32 4294967294, %s9629_s24   ;;  %s9629_s24 = sphi %s9683_s24, %s10269_s24   ;;  %s9625_s23 = sphi %s9681_s23, %s10268_s23   ;;  %s9621_s22 = sphi %s9679_s22, %s10267_s22   ;;  %s9617_s21 = sphi %s9677_s21, %s10266_s21  }
   0x4   : > { %s9702_s27 = sadd.s32 1, %s9629_s24   ;;  %s157_s28 = sadd.s32 1, %s9625_s23 }
   0x5   : > { %s154_s29 = ssub.s32 %s9629_s24, %s9702_s27  ;;  %p167_p0 = scmp.ne.s32.totalorder %s9625_s23, %s9621_s22 }
   0x6   : > { %p155_p1 = scmp.eq.s32.totalorder %s154_s29, 0  ;;  %p168_p2 = scmp.eq.s32.totalorder %s9698_s25, 1 }
   0x7   : > { %p173_p3 = scmp.ne.s32.totalorder %s9621_s22, %s9617_s21  ;;  %p174_p4 = scmp.eq.s32.totalorder %s9265_s26, 1 }
   0x8   : > { %s9713_s30 = scalar_select %p155_p1, %s9625_s23, %s157_s28  }
   0x9   : > { %p9715_p5 = por %p168_p2, %p167_p0  ;;  %p9719_p6 = por %p174_p4, %p173_p3 }
   0xa   : > { %p9268_p7 = scmp.ge.s32.totalorder %s9629_s24, 1  ;;  %p215_p8 = scmp.lt.s32.totalorder %s9629_s24, 3 }
   0xc   : > { %p216_p9 = pnand %p9268_p7, %p215_p8 }
   0xd   : > { %v260_v0 = vlaneseq (!%p216_p9)  ;;  %p245_p10 = scmp.lt.s32.totalorder (!%p216_p9), %s9698_s25, 1  ;;  %v9631_v1 = vmov (!%p216_p9), 0.0   ;;  %v253_v3 = vld [vmem:[%s10262_s5] ss:$2 sm:$0x3] (!%p216_p9)  ;;  %s9632_s16 = smov (!%p216_p9), 111  }
   0xe   : > { %219 = sbr.rel (%p216_p9) target bundleno = 2337 (0x921), region = 44  ;;  %250 = vst [vmem:[#allocation2] sm:$0xf] (!%p216_p9), %v9631_v1  ;;  %251 = vst [vmem:[#allocation2 + $0xc] sm:$0xf] (!%p216_p9), %v9631_v1  ;;  %368 = vmatprep.mubr.f32.mxu0 (!%p216_p9), %v9631_v1  ;;  %4846 = vmatprep.mubr.f32.mxu1 (!%p216_p9), %v9631_v1  ;;  %s9633_s19 = smov (!%p216_p9), 16  }
   0xf   : > { %v261_v2 = vshrl.u32 (!%p216_p9), %v260_v0, 7  ;;  %v9272_v10 = vld [vmem:[%s10262_s5 + $0x1] ss:$2 sm:$0x3] (!%p216_p9)  ;;  %s9634_s20 = smov (!%p216_p9), 113   ;;  %vm293_vm0 = vcmask (!%p216_p9), 31744  }
  0x10   : > { %v9273_v17 = vld [vmem:[%s10258_s1 + $0x4] sm:$0xf] (!%p216_p9)  ;;  %vm272_vm1 = vcmask (!%p216_p9), 908288   ;;  %s9635_s29 = smov (!%p216_p9), 17   ;;  %vm290_vm2 = vcmask (!%p216_p9), 130048   ;;  %vm297_vm3 = vcmask (!%p216_p9), 1043456  }
  0x11   : > { %v262_v4 = vsub.s32 (!%p216_p9), 0, %v261_v2  ;;  %v266_v5 = vsub.s32 (!%p216_p9), 1, %v261_v2  ;;  %v295_v18 = vsel (!%p216_p9), %vm293_vm0, %v9273_v17, 0  ;;  %vm1266_vm4 = vcmask (!%p216_p9), 924672   ;;  %s9637_s10 = smov (!%p216_p9), 15   ;;  %s9638_s13 = smov (!%p216_p9), 1  }
  0x12   : > { %v9763_v19 = vand.u32 (!%p216_p9), 4294901760, %v295_v18  ;;  %v278_v54 = vld [vmem:[%s10258_s1] sm:$0xf] (!%p216_p9)  ;;  %vm776_vm5 = vcmask (!%p216_p9), 138240   ;;  %vm1765_vm6 = vcmask (!%p216_p9), 1039360   ;;  %vm1283_vm7 = vcmask (!%p216_p9), 121856  }
  0x13   : > { %v263_v6 = vrot.slane (!%p216_p9), %v253_v3, %v262_v4  ;;  %v267_v7 = vrot.slane (!%p216_p9), %v253_v3, %v266_v5  ;;  %v1257_v11 = vrot.slane (!%p216_p9), %v9272_v10, %v262_v4  ;;  %v1261_v12 = vrot.slane (!%p216_p9), %v9272_v10, %v266_v5  ;;  %s9639_s26 = smov (!%p216_p9), 112  }
  0x14   : > { %v9766_v20 = vsub.f32 (!%p216_p9), %v295_v18, %v9763_v19  ;;  %v780_v55 = vsel (!%p216_p9), %vm293_vm0, %v278_v54, 0  ;;  %vm1782_vm8 = vcmask (!%p216_p9), 7168   ;;  %vm3745_vm9 = vcmask (!%p216_p9), 916480  }
  0x15   : > { %s246_s9 = scalar_select %p245_p10, %s9698_s25, 1  ;;  %v9740_v9 = vcombine.low %v263_v6, %v267_v7  ;;  %v9753_v16 = vcombine.low %v1257_v11, %v1261_v12  ;;  %v9814_v56 = vand.u32 4294901760, %v780_v55 }
  0x16   : > { %v371_v25 = vand.u32 4294901760, %v9766_v20 }
  0x17   : > { %s9294_s12 = sshll.u32 %s246_s9, 3  ;;  %269 = vrot.lane.b32.xlu0 %v9740_v9, %s9632_s16  ;;  %s9636_s9 = smov 127   ;;  %v854_v57 = vsub.f32 %v780_v55, %v9814_v56 }
  0x18   : > { %s249_s15 = scalar_lea.vmem %s10257_s0, %s9294_s12  ;;  %v372_v30 = vsub.f32 %v9766_v20, %v371_v25 }
  0x19   : > { %v9737_v8 = vld [vmem:[%s249_s15] sm:$0xff]  ;;  %v855_v59 = vand.u32 4294901760, %v854_v57 }
  0x1a   : > { %256 = vst [vmem:[#allocation2 + $0x4] sm:$0xff] %v9737_v8  ;;  %v373_v38 = vand.u32 4294901760, %v372_v30 }
  0x1b   : > { %v856_v3 = vsub.f32 %v854_v57, %v855_v59 }
  0x21   : > { %v9747_v13 = vld [vmem:[#allocation2] sm:$0xff]  ;;  %v258_v14 = vld [vmem:[#allocation2 + $0x8] sm:$0xf] }
  0x22   : > { %v283_v15 = vcombine.high %v9747_v13, %v9747_v13  ;;  %288 = vrot.lane.b32.xlu1 %v258_v14, %s9633_s19  ;;  %v1252_v39 = vld [vmem:[#allocation2 + $0x8] sm:$0xf] }
  0x23   : > { %v1761_v63 = vld [vmem:[#allocation2 + $0x8] sm:$0xf] }
  0x24   : > { %286 = vrot.lane.b32.xlu0 %v283_v15, %s9633_s19  ;;  %v857_v15 = vand.u32 4294901760, %v856_v3 }
  0x26   : > { %284 = vrot.lane.b32.xlu1 %v9747_v13, %s9633_s19 }
  0x28   : > { %1263 = vrot.lane.b32.xlu0 %v9753_v16, %s9634_s20 }
  0x89   : > { %v270_v21 = vpop.permute.xlu0 %269 }
  0x8a   : > { %v9768_v22 = vrot.slane %v270_v21, 4 }
  0x8c   : > { %v9772_v23 = vsel %vm272_vm1, %v9768_v22, %v270_v21  ;;  %v277_v24 = vmul.f32 %v9768_v22, %v258_v14 }
  0x8d   : > { %v276_v26 = vmul.f32 %v9772_v23, %v9747_v13 }
  0x8e   : > { %774 = vrot.lane.b32.xlu0 %v277_v24, %s9635_s29 }
  0x8f   : > { %v769_v28 = vcombine.high %v276_v26, %v276_v26 }
  0x91   : > { %772 = vrot.lane.b32.xlu1 %v769_v28, %s9635_s29 }
  0x92   : > { %1762 = vrot.lane.b32.xlu0 %v9740_v9, %s9636_s9 }
  0x94   : > { %v289_v27 = vpop.permute.xlu1 %288 }
  0x95   : > { %770 = vrot.lane.b32.xlu1 %v276_v26, %s9635_s29 }
  0x96   : > { %v287_v29 = vpop.permute.xlu0 %286 }
  0x97   : > { %v292_v31 = vsel %vm290_vm2, %v287_v29, %v289_v27 }
  0x98   : > { %v300_v32 = vsel %vm297_vm3, %v292_v31, 0  ;;  %v285_v33 = vpop.permute.xlu1 %284 }
  0x99   : > { %v302_v34 = vand.u32 4294901760, %v300_v32  ;;  %v291_v35 = vsel %vm290_vm2, %v285_v33, %v287_v29 }
  0x9a   : > { %v1264_v36 = vpop.permute.xlu0 %1263  ;;  %v298_v37 = vsel %vm297_vm3, %v291_v35, 0 }
  0x9b   : > { %v381_v40 = vsub.f32 %v300_v32, %v302_v34  ;;  %v9788_v41 = vrot.slane %v1264_v36, 4  ;;  %v304_v42 = vand.u32 4294901760, %v298_v37  ;;  %303 = vmatprep.subr.mxu0 %v302_v34  ;;  %v9274_v32 = vld [vmem:[%s10258_s1 + $0x8] sm:$0xf] }
  0x9d   : > { %v9792_v43 = vsel %vm1266_vm4, %v9788_v41, %v1264_v36  ;;  %v387_v44 = vsub.f32 %v298_v37, %v304_v42  ;;  %305 = vmatpush1.msra.mxu0 %v304_v42  ;;  %v1271_v45 = vmul.f32 %v9788_v41, %v1252_v39  ;;  %v382_v46 = vand.u32 4294901760, %v381_v40 }
  0x9e   : > { %v1270_v47 = vmul.f32 %v9792_v43, %v9747_v13  ;;  %374 = vmatmul.mubr.f32.vlgmr.msra.gmra.mrb[0].mxu0 %v373_v38 }
  0x9f   : > { %v388_v48 = vand.u32 4294901760, %v387_v44  ;;  %1281 = vrot.lane.b32.xlu0 %v1271_v45, %s9637_s10  ;;  %v383_v49 = vsub.f32 %v381_v40, %v382_v46  ;;  %454 = vmatprep.mubr.f32.mxu0 %v9631_v1 }
  0xa0   : > { %v1276_v50 = vcombine.high %v1270_v47, %v1270_v47 }
  0xa1   : > { %v384_v51 = vand.u32 4294901760, %v383_v49  ;;  %v389_v52 = vsub.f32 %v387_v44, %v388_v48 }
  0xa2   : > { %1279 = vrot.lane.b32.xlu1 %v1276_v50, %s9637_s10 }
  0xa3   : > { %385 = vmatprep.subr.mxu0 %v384_v51  ;;  %v390_v53 = vand.u32 4294901760, %v389_v52  ;;  %v9275_v52 = vld [vmem:[%s10258_s1 + $0xc] sm:$0xf] }
  0xa5   : > { %391 = vmatpush1.msra.mxu0 %v390_v53  ;;  %v1786_v53 = vsel %vm293_vm0, %v9275_v52, 0 }
  0xa6   : > { %1277 = vrot.lane.b32.xlu1 %v1270_v47, %s9637_s10  ;;  %456 = vmatmul.mubr.f32.vlgmr.msra.gmra.mrb[0].mxu0 %v9763_v19  ;;  %v9864_v54 = vand.u32 4294901760, %v1786_v53 }
  0xa7   : > { %464 = vmatprep.subr.mxu0 %v381_v40  ;;  %530 = vmatprep.mubr.f32.mxu0 %v9631_v1 }
  0xa8   : > { %467 = vmatpush1.msra.mxu0 %v387_v44  ;;  %v9867_v55 = vsub.f32 %v1786_v53, %v9864_v54 }
  0xa9   : > { %540 = vmatprep.subr.mxu0 %v302_v34 }
  0xae   : > { %533 = vmatmul.mubr.f32.vlgmr.msra.gmra.mrb[0].mxu0 %v9766_v20 }
  0xaf   : > { %542 = vmatpush1.msra.mxu0 %v304_v42  ;;  %605 = vmatprep.mubr.f32.mxu0 %v9631_v1 }
  0xb0   : > { %618 = vmatprep.subr.mxu0 %v382_v46 }
  0xb6   : > { %609 = vmatmul.mubr.f32.vlgmr.msra.gmra.mrb[0].mxu0 %v371_v25 }
  0xb7   : > { %622 = vmatpush1.msra.mxu0 %v388_v48  ;;  %685 = vmatprep.mubr.f32.mxu0 %v9631_v1 }
  0xb8   : > { %694 = vmatprep.subr.mxu0 %v302_v34  ;;  %v1287_v34 = vsel %vm293_vm0, %v9274_v32, 0 }
  0xb9   : > { %v1360_v37 = vand.u32 4294901760, %v1287_v34 }
  0xbb   : > { %v1361_v40 = vsub.f32 %v1287_v34, %v1360_v37  ;;  %v3733_v34 = vld [vmem:[#allocation2 + $0xc] sm:$0xf] }
  0xbd   : > { %v1362_v45 = vand.u32 4294901760, %v1361_v40 }
  0xbe   : > { %687 = vmatmul.mubr.f32.vlgmr.msra.gmra.mrb[0].mxu0 %v9763_v19 }
  0xbf   : > { %696 = vmatpush1.msra.mxu0 %v304_v42  ;;  %759 = vmatprep.mubr.f32.mxu0 %v9631_v1  ;;  %v1363_v48 = vsub.f32 %v1361_v40, %v1362_v45 }
  0xc1   : > { %v1364_v50 = vand.u32 4294901760, %v1363_v48 }
  0xc6   : > { %761 = vmatmul.mubr.f32.vlgmr.msra.gmra.mrb[0].mxu0 %v9763_v19 }
  0xc7   : > { %852 = vmatprep.mubr.f32.mxu0 %v9631_v1 }
 0x100   : > { %v775_v58 = vpop.permute.xlu0 %774 }
 0x103   : > { %v773_v60 = vpop.permute.xlu1 %772 }
 0x104   : > { %v778_v61 = vsel %vm776_vm5, %v773_v60, %v775_v58  ;;  %v1763_v62 = vpop.permute.xlu0 %1762 }
 0x105   : > { %v784_v0 = vsel %vm297_vm3, %v778_v61, 0  ;;  %v9819_v2 = vrot.slane %v1763_v62, 4  ;;  %v2739_v61 = vld [vmem:[#allocation2 + $0xc] sm:$0xf] }
 0x106   : > { %v786_v4 = vand.u32 4294901760, %v784_v0 }
 0x107   : > { %v9823_v5 = vsel %vm1765_vm6, %v9819_v2, %v1763_v62  ;;  %v771_v6 = vpop.permute.xlu1 %770  ;;  %v1770_v7 = vmul.f32 %v9819_v2, %v1761_v63 }
 0x108   : > { %v865_v10 = vsub.f32 %v784_v0, %v786_v4  ;;  %v1769_v11 = vmul.f32 %v9823_v5, %v9747_v13  ;;  %v777_v12 = vsel %vm776_vm5, %v771_v6, %v773_v60  ;;  %787 = vmatprep.subr.mxu0 %v786_v4 }
 0x109   : > { %v782_v14 = vsel %vm297_vm3, %v777_v12, 0  ;;  %1780 = vrot.lane.b32.xlu1 %v1770_v7, %s9638_s13 }
 0x10a   : > { %v788_v17 = vand.u32 4294901760, %v782_v14  ;;  %v1775_v18 = vcombine.high %v1769_v11, %v1769_v11  ;;  %v866_v19 = vand.u32 4294901760, %v865_v10 }
 0x10c   : > { %v871_v20 = vsub.f32 %v782_v14, %v788_v17  ;;  %1778 = vrot.lane.b32.xlu0 %v1775_v18, %s9638_s13  ;;  %789 = vmatpush1.msra.mxu0 %v788_v17  ;;  %v867_v21 = vsub.f32 %v865_v10, %v866_v19 }
 0x10d   : > { %2740 = vrot.lane.b32.xlu1 %v9753_v16, %s9638_s13  ;;  %858 = vmatmul.mubr.f32.vlgmr.msra.gmra.mrb[0].mxu0 %v857_v15 }
 0x10e   : > { %v872_v13 = vand.u32 4294901760, %v871_v20  ;;  %v868_v24 = vand.u32 4294901760, %v867_v21  ;;  %938 = vmatprep.mubr.f32.mxu0 %v9631_v1 }
 0x110   : > { %1776 = vrot.lane.b32.xlu0 %v1769_v11, %s9638_s13  ;;  %869 = vmatprep.subr.mxu0 %v868_v24  ;;  %v873_v25 = vsub.f32 %v871_v20, %v872_v13 }
 0x111   : > { %v1282_v27 = vpop.permute.xlu0 %1281 }
 0x112   : > { %v874_v26 = vand.u32 4294901760, %v873_v25  ;;  %v3236_v25 = vld [vmem:[#allocation2 + $0xc] sm:$0xf] }
 0x114   : > { %875 = vmatpush1.msra.mxu0 %v874_v26  ;;  %3237 = vrot.lane.b32.xlu0 %v9740_v9, %s9637_s10  ;;  %v1280_v28 = vpop.permute.xlu1 %1279 }
 0x115   : > { %940 = vmatmul.mubr.f32.vlgmr.msra.gmra.mrb[0].mxu0 %v9814_v56  ;;  %948 = vmatprep.subr.mxu0 %v865_v10  ;;  %v1285_v29 = vsel %vm1283_vm7, %v1280_v28, %v1282_v27 }
 0x116   : > { %951 = vmatpush1.msra.mxu0 %v871_v20  ;;  %1014 = vmatprep.mubr.f32.mxu0 %v9631_v1  ;;  %v1291_v30 = vsel %vm297_vm3, %v1285_v29, 0 }
 0x117   : > { %1024 = vmatprep.subr.mxu0 %v786_v4  ;;  %v1293_v31 = vand.u32 4294901760, %v1291_v30 }
 0x118   : > { %v1278_v9 = vpop.permute.xlu1 %1277 }
 0x119   : > { %v1284_v33 = vsel %vm1283_vm7, %v1278_v9, %v1280_v28  ;;  %v1372_v35 = vsub.f32 %v1291_v30, %v1293_v31 }
 0x11a   : > { %v1289_v36 = vsel %vm297_vm3, %v1284_v33, 0  ;;  %v9908_v33 = vcombine.high %v9737_v8, %v9737_v8 }
 0x11b   : > { %v1295_v38 = vand.u32 4294901760, %v1289_v36  ;;  %v1373_v39 = vand.u32 4294901760, %v1372_v35 }
 0x11d   : > { %1017 = vmatmul.mubr.f32.vlgmr.msra.gmra.mrb[0].mxu0 %v854_v57  ;;  %v1378_v42 = vsub.f32 %v1289_v36, %v1295_v38  ;;  %v1374_v44 = vsub.f32 %v1372_v35, %v1373_v39  ;;  %v1861_v57 = vand.u32 4294901760, %v9867_v55  ;;  %v9276_v36 = vld [vmem:[%s10258_s1 + $0x10] sm:$0xf] }
 0x11e   : > { %1026 = vmatpush1.msra.mxu0 %v788_v17  ;;  %1089 = vmatprep.mubr.f32.mxu0 %v9631_v1 }
 0x11f   : > { %1102 = vmatprep.subr.mxu0 %v866_v19  ;;  %v1379_v46 = vand.u32 4294901760, %v1378_v42  ;;  %v1375_v47 = vand.u32 4294901760, %v1374_v44  ;;  %v1862_v0 = vsub.f32 %v9867_v55, %v1861_v57 }
 0x121   : > { %v1380_v49 = vsub.f32 %v1378_v42, %v1379_v46  ;;  %v1863_v15 = vand.u32 4294901760, %v1862_v0 }
 0x123   : > { %v1381_v51 = vand.u32 4294901760, %v1380_v49 }
 0x125   : > { %1093 = vmatmul.mubr.f32.vlgmr.msra.gmra.mrb[0].mxu0 %v855_v59 }
 0x126   : > { %1106 = vmatpush1.msra.mxu0 %v872_v13  ;;  %1169 = vmatprep.mubr.f32.mxu0 %v9631_v1 }
 0x127   : > { %1178 = vmatprep.subr.mxu0 %v786_v4 }
 0x12d   : > { %1171 = vmatmul.mubr.f32.vlgmr.msra.gmra.mrb[0].mxu0 %v9814_v56 }
 0x12e   : > { %1180 = vmatpush1.msra.mxu0 %v788_v17  ;;  %1243 = vmatprep.mubr.f32.mxu0 %v9631_v1 }
 0x12f   : > { %1294 = vmatprep.subr.mxu0 %v1293_v31 }
 0x135   : > { %1245 = vmatmul.mubr.f32.vlgmr.msra.gmra.mrb[0].mxu0 %v9814_v56 }
 0x136   : > { %1296 = vmatpush1.msra.mxu0 %v1295_v38  ;;  %1359 = vmatprep.mubr.f32.mxu0 %v9631_v1 }
 0x137   : > { %1376 = vmatprep.subr.mxu0 %v1375_v47 }
 0x13d   : > { %1365 = vmatmul.mubr.f32.vlgmr.msra.gmra.mrb[0].mxu0 %v1364_v50 }
 0x13e   : > { %1382 = vmatpush1.msra.mxu0 %v1381_v51  ;;  %1445 = vmatprep.mubr.f32.mxu0 %v9631_v1 }
 0x13f   : > { %1455 = vmatprep.subr.mxu0 %v1372_v35 }
 0x145   : > { %1447 = vmatmul.mubr.f32.vlgmr.msra.gmra.mrb[0].mxu0 %v1360_v37 }
 0x146   : > { %1458 = vmatpush1.msra.mxu0 %v1378_v42  ;;  %1521 = vmatprep.mubr.f32.mxu0 %v9631_v1 }
 0x147   : > { %1531 = vmatprep.subr.mxu0 %v1293_v31 }
 0x14d   : > { %1524 = vmatmul.mubr.f32.vlgmr.msra.gmra.mrb[0].mxu0 %v1361_v40 }
 0x14e   : > { %1533 = vmatpush1.msra.mxu0 %v1295_v38  ;;  %1596 = vmatprep.mubr.f32.mxu0 %v9631_v1 }
 0x14f   : > { %1609 = vmatprep.subr.mxu0 %v1373_v39 }
 0x155   : > { %1600 = vmatmul.mubr.f32.vlgmr.msra.gmra.mrb[0].mxu0 %v1362_v45 }
 0x156   : > { %1613 = vmatpush1.msra.mxu0 %v1379_v46  ;;  %1676 = vmatprep.mubr.f32.mxu0 %v9631_v1 }
 0x157   : > { %1685 = vmatprep.subr.mxu0 %v1293_v31 }
 0x15d   : > { %1678 = vmatmul.mubr.f32.vlgmr.msra.gmra.mrb[0].mxu0 %v1360_v37 }
 0x15e   : > { %1687 = vmatpush1.msra.mxu0 %v1295_v38  ;;  %1750 = vmatprep.mubr.f32.mxu0 %v9631_v1  ;;  %v2267_v38 = vsel %vm297_vm3, %v9737_v8, 0 }
 0x15f   : > { %v2273_v42 = vand.u32 4294901760, %v2267_v38 }
 0x161   : > { %v2356_v46 = vsub.f32 %v2267_v38, %v2273_v42  ;;  %v9278_v38 = vld [vmem:[%s10258_s1 + $0x18] sm:$0xf] }
 0x163   : > { %v2357_v49 = vand.u32 4294901760, %v2356_v46 }
 0x165   : > { %1752 = vmatmul.mubr.f32.vlgmr.msra.gmra.mrb[0].mxu0 %v1360_v37  ;;  %v2265_v37 = vsel %vm293_vm0, %v9276_v36, 0  ;;  %v2358_v52 = vsub.f32 %v2356_v46, %v2357_v49 }
 0x166   : > { %1858 = vmatprep.mubr.f32.mxu0 %v9631_v1  ;;  %v2338_v40 = vand.u32 4294901760, %v2265_v37 }
 0x168   : > { %v2339_v45 = vsub.f32 %v2265_v37, %v2338_v40 }
 0x16a   : > { %v2340_v48 = vand.u32 4294901760, %v2339_v45 }
 0x16c   : > { %v2341_v51 = vsub.f32 %v2339_v45, %v2340_v48 }
 0x16e   : > { %v2342_v53 = vand.u32 4294901760, %v2341_v51 }
 0x17b   : > { %v1781_v56 = vpop.permute.xlu1 %1780 }
 0x17e   : > { %v1779_v58 = vpop.permute.xlu0 %1778 }
 0x17f   : > { %v1784_v59 = vsel %vm1782_vm8, %v1779_v58, %v1781_v56  ;;  %v2741_v60 = vpop.permute.xlu1 %2740 }
 0x180   : > { %v1790_v62 = vsel %vm297_vm3, %v1784_v59, 0  ;;  %v9872_v63 = vrot.slane %v2741_v60, 4 }
 0x181   : > { %v1792_v3 = vand.u32 4294901760, %v1790_v62 }
 0x182   : > { %v9879_v4 = vsel %vm1782_vm8, %v9872_v63, %v2741_v60  ;;  %v1777_v6 = vpop.permute.xlu0 %1776  ;;  %v2747_v7 = vmul.f32 %v9872_v63, %v2739_v61 }
 0x183   : > { %v1871_v10 = vsub.f32 %v1790_v62, %v1792_v3  ;;  %v2746_v11 = vmul.f32 %v9879_v4, %v9737_v8  ;;  %v1783_v12 = vsel %vm1782_vm8, %v1777_v6, %v1779_v58  ;;  %1793 = vmatprep.subr.mxu0 %v1792_v3 }
 0x184   : > { %v1788_v14 = vsel %vm297_vm3, %v1783_v12, 0  ;;  %2757 = vrot.lane.b32.xlu0 %v2747_v7, %s9636_s9 }
 0x185   : > { %v1794_v17 = vand.u32 4294901760, %v1788_v14  ;;  %v2752_v18 = vcombine.high %v2746_v11, %v2746_v11  ;;  %v1872_v19 = vand.u32 4294901760, %v1871_v10 }
 0x186   : > { %v3238_v20 = vpop.permute.xlu0 %3237 }
 0x187   : > { %v1877_v21 = vsub.f32 %v1788_v14, %v1794_v17  ;;  %1795 = vmatpush1.msra.mxu0 %v1794_v17  ;;  %2755 = vrot.lane.b32.xlu1 %v2752_v18, %s9636_s9  ;;  %v9888_v13 = vrot.slane %v3238_v20, 4  ;;  %v1873_v24 = vsub.f32 %v1871_v10, %v1872_v19 }
 0x188   : > { %1864 = vmatmul.mubr.f32.vlgmr.msra.gmra.mrb[0].mxu0 %v1863_v15 }
 0x189   : > { %v1878_v26 = vand.u32 4294901760, %v1877_v21  ;;  %v9892_v27 = vsel %vm1283_vm7, %v9888_v13, %v3238_v20  ;;  %v1874_v28 = vand.u32 4294901760, %v1873_v24  ;;  %1944 = vmatprep.mubr.f32.mxu0 %v9631_v1  ;;  %v3244_v9 = vmul.f32 %v9888_v13, %v3236_v25 }
 0x18a   : > { %v3243_v29 = vmul.f32 %v9892_v27, %v9737_v8 }
 0x18b   : > { %1875 = vmatprep.subr.mxu0 %v1874_v28  ;;  %2753 = vrot.lane.b32.xlu1 %v2746_v11, %s9636_s9  ;;  %v1879_v30 = vsub.f32 %v1877_v21, %v1878_v26 }
 0x18c   : > { %v3249_v31 = vcombine.high %v3243_v29, %v3243_v29 }
 0x18d   : > { %v1880_v32 = vand.u32 4294901760, %v1879_v30 }
 0x18e   : > { %3252 = vrot.lane.b32.xlu0 %v3249_v31, %s9634_s20 }
 0x18f   : > { %1881 = vmatpush1.msra.mxu0 %v1880_v32  ;;  %3254 = vrot.lane.b32.xlu1 %v3244_v9, %s9634_s20 }
 0x190   : > { %1946 = vmatmul.mubr.f32.vlgmr.msra.gmra.mrb[0].mxu0 %v9864_v54  ;;  %1954 = vmatprep.subr.mxu0 %v1871_v10 }
 0x191   : > { %1957 = vmatpush1.msra.mxu0 %v1877_v21  ;;  %2020 = vmatprep.mubr.f32.mxu0 %v9631_v1 }
 0x192   : > { %2030 = vmatprep.subr.mxu0 %v1792_v3  ;;  %3250 = vrot.lane.b32.xlu0 %v3243_v29, %s9634_s20 }
 0x193   : > { %4224 = vrot.lane.b32.xlu1 %v9753_v16, %s9635_s29  ;;  %v2269_v16 = vsel %vm297_vm3, %v9908_v33, 0 }
 0x194   : > { %v2271_v35 = vand.u32 4294901760, %v2269_v16 }
 0x196   : > { %3741 = vrot.lane.b32.xlu0 %v9908_v33, %s9639_s26  ;;  %v2350_v39 = vsub.f32 %v2269_v16, %v2271_v35 }
 0x197   : > { %3743 = vrot.lane.b32.xlu1 %v3733_v34, %s9639_s26 }
 0x198   : > { %2023 = vmatmul.mubr.f32.vlgmr.msra.gmra.mrb[0].mxu0 %v9867_v55  ;;  %v2351_v44 = vand.u32 4294901760, %v2350_v39  ;;  %v2359_v55 = vand.u32 4294901760, %v2358_v52 }
 0x199   : > { %2032 = vmatpush1.msra.mxu0 %v1794_v17  ;;  %2095 = vmatprep.mubr.f32.mxu0 %v9631_v1 }
 0x19a   : > { %2108 = vmatprep.subr.mxu0 %v1872_v19  ;;  %3739 = vrot.lane.b32.xlu0 %v9737_v8, %s9639_s26  ;;  %v2352_v47 = vsub.f32 %v2350_v39, %v2351_v44 }
 0x19c   : > { %v2353_v50 = vand.u32 4294901760, %v2352_v47 }
 0x1a0   : > { %2099 = vmatmul.mubr.f32.vlgmr.msra.gmra.mrb[0].mxu0 %v1861_v57 }
 0x1a1   : > { %2112 = vmatpush1.msra.mxu0 %v1878_v26  ;;  %2175 = vmatprep.mubr.f32.mxu0 %v9631_v1  ;;  %v4223_v26 = vld [vmem:[#allocation2 + $0xc] sm:$0xf] }
 0x1a2   : > { %2184 = vmatprep.subr.mxu0 %v1792_v3 }
 0x1a8   : > { %2177 = vmatmul.mubr.f32.vlgmr.msra.gmra.mrb[0].mxu0 %v9864_v54 }
 0x1a9   : > { %2186 = vmatpush1.msra.mxu0 %v1794_v17  ;;  %2249 = vmatprep.mubr.f32.mxu0 %v9631_v1 }
 0x1aa   : > { %2272 = vmatprep.subr.mxu0 %v2271_v35 }
 0x1b0   : > { %2251 = vmatmul.mubr.f32.vlgmr.msra.gmra.mrb[0].mxu0 %v9864_v54  ;;  %v9277_v54 = vld [vmem:[%s10258_s1 + $0x14] sm:$0xf] }
 0x1b1   : > { %2274 = vmatpush1.msra.mxu0 %v2273_v42  ;;  %2337 = vmatprep.mubr.f32.mxu0 %v9631_v1  ;;  %v2762_v56 = vsel %vm293_vm0, %v9277_v54, 0 }
 0x1b2   : > { %2354 = vmatprep.subr.mxu0 %v2353_v50  ;;  %v9942_v57 = vand.u32 4294901760, %v2762_v56 }
 0x1b4   : > { %v2836_v58 = vsub.f32 %v2762_v56, %v9942_v57 }
 0x1b6   : > { %v2837_v59 = vand.u32 4294901760, %v2836_v58 }
 0x1b8   : > { %2343 = vmatmul.mubr.f32.vlgmr.msra.gmra.mrb[0].mxu0 %v2342_v53  ;;  %v2838_v3 = vsub.f32 %v2836_v58, %v2837_v59 }
 0x1b9   : > { %2360 = vmatpush1.msra.mxu0 %v2359_v55  ;;  %2423 = vmatprep.mubr.f32.mxu0 %v9631_v1 }
 0x1ba   : > { %2433 = vmatprep.subr.mxu0 %v2350_v39  ;;  %v2839_v14 = vand.u32 4294901760, %v2838_v3 }
 0x1c0   : > { %2425 = vmatmul.mubr.f32.vlgmr.msra.gmra.mrb[0].mxu0 %v2338_v40 }
 0x1c1   : > { %2436 = vmatpush1.msra.mxu0 %v2356_v46  ;;  %2499 = vmatprep.mubr.f32.mxu0 %v9631_v1 }
 0x1c2   : > { %2509 = vmatprep.subr.mxu0 %v2271_v35 }
 0x1c8   : > { %2502 = vmatmul.mubr.f32.vlgmr.msra.gmra.mrb[0].mxu0 %v2339_v45 }
 0x1c9   : > { %2511 = vmatpush1.msra.mxu0 %v2273_v42  ;;  %2574 = vmatprep.mubr.f32.mxu0 %v9631_v1 }
 0x1ca   : > { %2587 = vmatprep.subr.mxu0 %v2351_v44 }
 0x1d0   : > { %2578 = vmatmul.mubr.f32.vlgmr.msra.gmra.mrb[0].mxu0 %v2340_v48 }
 0x1d1   : > { %2591 = vmatpush1.msra.mxu0 %v2357_v49  ;;  %2654 = vmatprep.mubr.f32.mxu0 %v9631_v1 }
 0x1d2   : > { %2663 = vmatprep.subr.mxu0 %v2271_v35 }
 0x1d8   : > { %2656 = vmatmul.mubr.f32.vlgmr.msra.gmra.mrb[0].mxu0 %v2338_v40 }
 0x1d9   : > { %2665 = vmatpush1.msra.mxu0 %v2273_v42  ;;  %2728 = vmatprep.mubr.f32.mxu0 %v9631_v1  ;;  %v3259_v42 = vsel %vm293_vm0, %v9278_v38, 0 }
 0x1da   : > { %v9974_v46 = vand.u32 4294901760, %v3259_v42 }
 0x1dc   : > { %v3333_v49 = vsub.f32 %v3259_v42, %v9974_v46 }
 0x1de   : > { %v3334_v52 = vand.u32 4294901760, %v3333_v49 }
 0x1e0   : > { %2730 = vmatmul.mubr.f32.vlgmr.msra.gmra.mrb[0].mxu0 %v2338_v40  ;;  %v3335_v54 = vsub.f32 %v3333_v49, %v3334_v52 }
 0x1e1   : > { %2834 = vmatprep.mubr.f32.mxu0 %v9631_v1 }
 0x1f6   : > { %v2758_v60 = vpop.permute.xlu0 %2757 }
 0x1f9   : > { %v2756_v61 = vpop.permute.xlu1 %2755 }
 0x1fa   : > { %v2760_v62 = vsel %vm1765_vm6, %v2756_v61, %v2758_v60  ;;  %v9640_v60 = vmov 0  }
 0x1fb   : > { %v2766_v0 = vsel %vm297_vm3, %v2760_v62, 0  ;;  %9557 = vset.pattern.permute.xlu0 %v9640_v60 }
 0x1fc   : > { %v2768_v6 = vand.u32 4294901760, %v2766_v0 }
 0x1fd   : > { %v2754_v7 = vpop.permute.xlu1 %2753 }
 0x1fe   : > { %v2847_v10 = vsub.f32 %v2766_v0, %v2768_v6  ;;  %v2759_v11 = vsel %vm1765_vm6, %v2754_v7, %v2756_v61  ;;  %2769 = vmatprep.subr.mxu0 %v2768_v6 }
 0x1ff   : > { %v2764_v12 = vsel %vm297_vm3, %v2759_v11, 0 }
 0x200   : > { %v2770_v15 = vand.u32 4294901760, %v2764_v12  ;;  %v2848_v17 = vand.u32 4294901760, %v2847_v10  ;;  %v3253_v16 = vpop.permute.xlu0 %3252 }
 0x201   : > { %v3255_v18 = vpop.permute.xlu1 %3254 }
 0x202   : > { %v2853_v19 = vsub.f32 %v2764_v12, %v2770_v15  ;;  %2771 = vmatpush1.msra.mxu0 %v2770_v15  ;;  %v2849_v20 = vsub.f32 %v2847_v10, %v2848_v17  ;;  %v3257_v35 = vsel %vm1266_vm4, %v3253_v16, %v3255_v18 }
 0x203   : > { %2840 = vmatmul.mubr.f32.vlgmr.msra.gmra.mrb[0].mxu0 %v2839_v14  ;;  %v3263_v36 = vsel %vm297_vm3, %v3257_v35, 0 }
 0x204   : > { %v2854_v21 = vand.u32 4294901760, %v2853_v19  ;;  %v2850_v24 = vand.u32 4294901760, %v2849_v20  ;;  %2920 = vmatprep.mubr.f32.mxu0 %v9631_v1  ;;  %v3251_v37 = vpop.permute.xlu0 %3250  ;;  %v3265_v39 = vand.u32 4294901760, %v3263_v36 }
 0x205   : > { %v4225_v25 = vpop.permute.xlu1 %4224  ;;  %v3256_v40 = vsel %vm1266_vm4, %v3251_v37, %v3253_v16  ;;  %v9280_v16 = vld [vmem:[%s10258_s1 + $0x20] sm:$0xf] }
 0x206   : > { %v9950_v28 = vrot.slane %v4225_v25, 4  ;;  %2851 = vmatprep.subr.mxu0 %v2850_v24  ;;  %v2855_v29 = vsub.f32 %v2853_v19, %v2854_v21  ;;  %v3344_v44 = vsub.f32 %v3263_v36, %v3265_v39  ;;  %v3261_v45 = vsel %vm297_vm3, %v3256_v40, 0 }
 0x207   : > { %v3267_v47 = vand.u32 4294901760, %v3261_v45  ;;  %v4246_v35 = vsel %vm293_vm0, %v9280_v16, 0 }
 0x208   : > { %v9954_v30 = vsel %vm776_vm5, %v9950_v28, %v4225_v25  ;;  %v2856_v9 = vand.u32 4294901760, %v2855_v29  ;;  %v4231_v31 = vmul.f32 %v9950_v28, %v4223_v26  ;;  %v3345_v48 = vand.u32 4294901760, %v3344_v44  ;;  %v3742_v62 = vpop.permute.xlu0 %3741 }
 0x209   : > { %v4230_v32 = vmul.f32 %v9954_v30, %v9737_v8  ;;  %v3350_v50 = vsub.f32 %v3261_v45, %v3267_v47  ;;  %v3744_v61 = vpop.permute.xlu1 %3743  ;;  %v4319_v38 = vand.u32 4294901760, %v4246_v35 }
 0x20a   : > { %2857 = vmatpush1.msra.mxu0 %v2856_v9  ;;  %4241 = vrot.lane.b32.xlu0 %v4231_v31, %s9632_s16  ;;  %v3346_v51 = vsub.f32 %v3344_v44, %v3345_v48  ;;  %v3747_v0 = vsel %vm3745_vm9, %v3742_v62, %v3744_v61 }
 0x20b   : > { %2922 = vmatmul.mubr.f32.vlgmr.msra.gmra.mrb[0].mxu0 %v9942_v57  ;;  %2930 = vmatprep.subr.mxu0 %v2847_v10  ;;  %v4236_v34 = vcombine.high %v4230_v32, %v4230_v32  ;;  %v3351_v53 = vand.u32 4294901760, %v3350_v50  ;;  %v3753_v3 = vsel %vm297_vm3, %v3747_v0, 0  ;;  %v9279_v10 = vld [vmem:[%s10258_s1 + $0x1c] sm:$0xf]  ;;  %v4320_v45 = vsub.f32 %v4246_v35, %v4319_v38 }
 0x20c   : > { %2933 = vmatpush1.msra.mxu0 %v2853_v19  ;;  %2996 = vmatprep.mubr.f32.mxu0 %v9631_v1  ;;  %v3347_v55 = vand.u32 4294901760, %v3346_v51  ;;  %v3755_v7 = vand.u32 4294901760, %v3753_v3  ;;  %v3749_v12 = vsel %vm293_vm0, %v9279_v10, 0 }
 0x20d   : > { %3006 = vmatprep.subr.mxu0 %v2768_v6  ;;  %4239 = vrot.lane.b32.xlu1 %v4236_v34, %s9632_s16  ;;  %v3352_v56 = vsub.f32 %v3350_v50, %v3351_v53  ;;  %v4321_v51 = vand.u32 4294901760, %v4320_v45 }
 0x211   : > { %4237 = vrot.lane.b32.xlu1 %v4230_v32, %s9632_s16 }
 0x213   : > { %2999 = vmatmul.mubr.f32.vlgmr.msra.gmra.mrb[0].mxu0 %v2836_v58  ;;  %v3336_v58 = vand.u32 4294901760, %v3335_v54 }
 0x214   : > { %3008 = vmatpush1.msra.mxu0 %v2770_v15  ;;  %3071 = vmatprep.mubr.f32.mxu0 %v9631_v1 }
 0x215   : > { %3084 = vmatprep.subr.mxu0 %v2848_v17  ;;  %v3822_v17 = vand.u32 4294901760, %v3749_v12 }
 0x217   : > { %v3823_v20 = vsub.f32 %v3749_v12, %v3822_v17 }
 0x219   : > { %v3824_v25 = vand.u32 4294901760, %v3823_v20 }
 0x21b   : > { %3075 = vmatmul.mubr.f32.vlgmr.msra.gmra.mrb[0].mxu0 %v2837_v59  ;;  %v3353_v59 = vand.u32 4294901760, %v3352_v56  ;;  %v3825_v9 = vsub.f32 %v3823_v20, %v3824_v25  ;;  %v4322_v56 = vsub.f32 %v4320_v45, %v4321_v51 }
 0x21c   : > { %3088 = vmatpush1.msra.mxu0 %v2854_v21  ;;  %3151 = vmatprep.mubr.f32.mxu0 %v9631_v1 }
 0x21d   : > { %3160 = vmatprep.subr.mxu0 %v2768_v6  ;;  %v3740_v6 = vpop.permute.xlu0 %3739  ;;  %v3826_v32 = vand.u32 4294901760, %v3825_v9 }
 0x21e   : > { %v3746_v11 = vsel %vm3745_vm9, %v3740_v6, %v3742_v62 }
 0x21f   : > { %v3751_v14 = vsel %vm297_vm3, %v3746_v11, 0 }
 0x220   : > { %v3757_v18 = vand.u32 4294901760, %v3751_v14 }
 0x222   : > { %v3840_v21 = vsub.f32 %v3751_v14, %v3757_v18 }
 0x223   : > { %3153 = vmatmul.mubr.f32.vlgmr.msra.gmra.mrb[0].mxu0 %v9942_v57 }
 0x224   : > { %3162 = vmatpush1.msra.mxu0 %v2770_v15  ;;  %3225 = vmatprep.mubr.f32.mxu0 %v9631_v1  ;;  %v3834_v15 = vsub.f32 %v3753_v3, %v3755_v7  ;;  %v3841_v26 = vand.u32 4294901760, %v3840_v21 }
 0x225   : > { %3266 = vmatprep.subr.mxu0 %v3265_v39 }
 0x226   : > { %v3835_v19 = vand.u32 4294901760, %v3834_v15  ;;  %v3842_v31 = vsub.f32 %v3840_v21, %v3841_v26 }
 0x228   : > { %v3836_v24 = vsub.f32 %v3834_v15, %v3835_v19  ;;  %v3843_v34 = vand.u32 4294901760, %v3842_v31 }
 0x22a   : > { %v3837_v29 = vand.u32 4294901760, %v3836_v24 }
 0x22b   : > { %3227 = vmatmul.mubr.f32.vlgmr.msra.gmra.mrb[0].mxu0 %v9942_v57  ;;  %v4719_v57 = vld [vmem:[%s10259_s2] sm:$0xf] }
 0x22c   : > { %3268 = vmatpush1.msra.mxu0 %v3267_v47  ;;  %3331 = vmatprep.mubr.f32.mxu0 %v9631_v1 }
 0x22d   : > { %3348 = vmatprep.subr.mxu0 %v3347_v55  ;;  %4722 = vperm.xlu0 %9557, %v4719_v57  }
 0x233   : > { %3337 = vmatmul.mubr.f32.vlgmr.msra.gmra.mrb[0].mxu0 %v3336_v58 }
 0x234   : > { %3354 = vmatpush1.msra.mxu0 %v3353_v59  ;;  %3417 = vmatprep.mubr.f32.mxu0 %v9631_v1  ;;  %v4323_v59 = vand.u32 4294901760, %v4322_v56 }
 0x235   : > { %3427 = vmatprep.subr.mxu0 %v3344_v44 }
 0x23b   : > { %3419 = vmatmul.mubr.f32.vlgmr.msra.gmra.mrb[0].mxu0 %v9974_v46 }
 0x23c   : > { %3430 = vmatpush1.msra.mxu0 %v3350_v50  ;;  %3493 = vmatprep.mubr.f32.mxu0 %v9631_v1 }
 0x23d   : > { %3503 = vmatprep.subr.mxu0 %v3265_v39 }
 0x243   : > { %3496 = vmatmul.mubr.f32.vlgmr.msra.gmra.mrb[0].mxu0 %v3333_v49 }
 0x244   : > { %3505 = vmatpush1.msra.mxu0 %v3267_v47  ;;  %3568 = vmatprep.mubr.f32.mxu0 %v9631_v1 }
 0x245   : > { %3581 = vmatprep.subr.mxu0 %v3345_v48 }
 0x24b   : > { %3572 = vmatmul.mubr.f32.vlgmr.msra.gmra.mrb[0].mxu0 %v3334_v52 }
 0x24c   : > { %3585 = vmatpush1.msra.mxu0 %v3351_v53  ;;  %3648 = vmatprep.mubr.f32.mxu0 %v9631_v1 }
 0x24d   : > { %3657 = vmatprep.subr.mxu0 %v3265_v39 }
 0x253   : > { %3650 = vmatmul.mubr.f32.vlgmr.msra.gmra.mrb[0].mxu0 %v9974_v46 }
 0x254   : > { %3659 = vmatpush1.msra.mxu0 %v3267_v47  ;;  %3722 = vmatprep.mubr.f32.mxu0 %v9631_v1 }
 0x255   : > { %3756 = vmatprep.subr.mxu0 %v3755_v7 }
 0x25b   : > { %3724 = vmatmul.mubr.f32.vlgmr.msra.gmra.mrb[0].mxu0 %v9974_v46 }
 0x25c   : > { %3758 = vmatpush1.msra.mxu0 %v3757_v18  ;;  %3821 = vmatprep.mubr.f32.mxu0 %v9631_v1 }
 0x25d   : > { %3838 = vmatprep.subr.mxu0 %v3837_v29 }
 0x263   : > { %3827 = vmatmul.mubr.f32.vlgmr.msra.gmra.mrb[0].mxu0 %v3826_v32 }
 0x264   : > { %3844 = vmatpush1.msra.mxu0 %v3843_v34  ;;  %3907 = vmatprep.mubr.f32.mxu0 %v9631_v1 }
 0x265   : > { %3917 = vmatprep.subr.mxu0 %v3834_v15 }
 0x26b   : > { %3909 = vmatmul.mubr.f32.vlgmr.msra.gmra.mrb[0].mxu0 %v3822_v17 }
 0x26c   : > { %3920 = vmatpush1.msra.mxu0 %v3840_v21  ;;  %3983 = vmatprep.mubr.f32.mxu0 %v9631_v1 }
 0x26d   : > { %3993 = vmatprep.subr.mxu0 %v3755_v7 }
 0x273   : > { %3986 = vmatmul.mubr.f32.vlgmr.msra.gmra.mrb[0].mxu0 %v3823_v20 }
 0x274   : > { %3995 = vmatpush1.msra.mxu0 %v3757_v18  ;;  %4058 = vmatprep.mubr.f32.mxu0 %v9631_v1 }
 0x275   : > { %4071 = vmatprep.subr.mxu0 %v3835_v19 }
 0x27b   : > { %4062 = vmatmul.mubr.f32.vlgmr.msra.gmra.mrb[0].mxu0 %v3824_v25 }
 0x27c   : > { %4075 = vmatpush1.msra.mxu0 %v3841_v26  ;;  %4138 = vmatprep.mubr.f32.mxu0 %v9631_v1  ;;  %v4242_v36 = vpop.permute.xlu0 %4241 }
 0x27d   : > { %4147 = vmatprep.subr.mxu0 %v3755_v7 }
 0x27f   : > { %v4240_v37 = vpop.permute.xlu1 %4239 }
 0x280   : > { %v4244_v39 = vsel %vm272_vm1, %v4240_v37, %v4242_v36 }
 0x281   : > { %v4250_v40 = vsel %vm297_vm3, %v4244_v39, 0 }
 0x282   : > { %v4252_v42 = vand.u32 4294901760, %v4250_v40 }
 0x283   : > { %4140 = vmatmul.mubr.f32.vlgmr.msra.gmra.mrb[0].mxu0 %v3822_v17  ;;  %v4238_v44 = vpop.permute.xlu1 %4237 }
 0x284   : > { %v4331_v46 = vsub.f32 %v4250_v40, %v4252_v42  ;;  %4149 = vmatpush1.msra.mxu0 %v3757_v18  ;;  %v4243_v47 = vsel %vm272_vm1, %v4238_v44, %v4240_v37  ;;  %4212 = vmatprep.mubr.f32.mxu0 %v9631_v1 }
 0x285   : > { %v4248_v48 = vsel %vm297_vm3, %v4243_v47, 0  ;;  %4253 = vmatprep.subr.mxu0 %v4252_v42 }
 0x286   : > { %v4254_v49 = vand.u32 4294901760, %v4248_v48  ;;  %v4332_v50 = vand.u32 4294901760, %v4331_v46 }
 0x288   : > { %v4337_v52 = vsub.f32 %v4248_v48, %v4254_v49  ;;  %v4333_v53 = vsub.f32 %v4331_v46, %v4332_v50 }
 0x28a   : > { %v4338_v55 = vand.u32 4294901760, %v4337_v52  ;;  %v4334_v54 = vand.u32 4294901760, %v4333_v53  ;;  %v8661_v53 = vld [vmem:[#allocation2 + $0xc] sm:$0xf] }
 0x28b   : > { %4214 = vmatmul.mubr.f32.vlgmr.msra.gmra.mrb[0].mxu0 %v3822_v17 }
 0x28c   : > { %4255 = vmatpush1.msra.mxu0 %v4254_v49  ;;  %4318 = vmatprep.mubr.f32.mxu0 %v9631_v1  ;;  %v4339_v58 = vsub.f32 %v4337_v52, %v4338_v55 }
 0x28d   : > { %4335 = vmatprep.subr.mxu0 %v4334_v54 }
 0x28e   : > { %v4340_v57 = vand.u32 4294901760, %v4339_v58 }
 0x293   : > { %4324 = vmatmul.mubr.f32.vlgmr.msra.gmra.mrb[0].mxu0 %v4323_v59 }
 0x294   : > { %4341 = vmatpush1.msra.mxu0 %v4340_v57  ;;  %4404 = vmatprep.mubr.f32.mxu0 %v9631_v1 }
 0x295   : > { %4414 = vmatprep.subr.mxu0 %v4331_v46 }
 0x29b   : > { %4406 = vmatmul.mubr.f32.vlgmr.msra.gmra.mrb[0].mxu0 %v4319_v38 }
 0x29c   : > { %4417 = vmatpush1.msra.mxu0 %v4337_v52  ;;  %4480 = vmatprep.mubr.f32.mxu0 %v9631_v1 }
 0x29d   : > { %4490 = vmatprep.subr.mxu0 %v4252_v42 }
 0x2a3   : > { %4483 = vmatmul.mubr.f32.vlgmr.msra.gmra.mrb[0].mxu0 %v4320_v45 }
 0x2a4   : > { %4492 = vmatpush1.msra.mxu0 %v4254_v49  ;;  %4555 = vmatprep.mubr.f32.mxu0 %v9631_v1 }
 0x2a5   : > { %4568 = vmatprep.subr.mxu0 %v4332_v50  ;;  %v7681_v50 = vld [vmem:[#allocation2 + $0xc] sm:$0xf] }
 0x2ab   : > { %4559 = vmatmul.mubr.f32.vlgmr.msra.gmra.mrb[0].mxu0 %v4321_v51 }
 0x2ac   : > { %4572 = vmatpush1.msra.mxu0 %v4338_v55  ;;  %4635 = vmatprep.mubr.f32.mxu0 %v9631_v1  ;;  %v4723_v60 = vpop.permute.xlu0 %4722  ;;  %v9151_v55 = vld [vmem:[%s10261_s4] sm:$0xf] }
 0x2ad   : > { %4644 = vmatprep.subr.mxu0 %v4252_v42 }
 0x2b3   : > { %4637 = vmatmul.mubr.f32.vlgmr.msra.gmra.mrb[0].mxu0 %v4319_v38 }
 0x2b4   : > { %4646 = vmatpush1.msra.mxu0 %v4254_v49  ;;  %4709 = vmatprep.mubr.f32.mxu0 %v9631_v1 }
 0x2bb   : > { %4711 = vmatmul.mubr.f32.vlgmr.msra.gmra.mrb[0].mxu0 %v4319_v38 }
 0x38e   : > { %v4712_v61 = vpop.f32.mrb[0].mxu0 }
 0x38f   : > { %v4725_v62 = vadd.f32 %v4723_v60, %v4712_v61  ;;  %v4714_v0 = vpop.f32.mrb[1].mxu0 }
 0x390   : > { %v4726_v3 = vadd.f32 %v4723_v60, %v4714_v0 }
 0x391   : > { %v4727_v6 = vsel %vm297_vm3, %v4725_v62, 0.0 }
 0x392   : > { %v4728_v7 = vsel %vm297_vm3, %v4726_v3, 0.0 }
 0x393   : > { %v4729_v10 = vadd.f32 %v4728_v7, %v4727_v6 }
 0x395   : > { %4730 = vadd.xlane.f32.xlu1 %v4729_v10 }
 0x422   : > { %v4731_v11 = vpop.xlane.xlu1 %4730 }
 0x423   : > { %v4733_v12 = vmul.f32 0.00390625, %v4731_v11 }
 0x425   : > { %v4734_v14 = vsub.f32 %v4725_v62, %v4733_v12  ;;  %v4735_v15 = vsub.f32 %v4726_v3, %v4733_v12 }
 0x427   : > { %v4736_v17 = vmul.f32 %v4734_v14, %v4734_v14  ;;  %v4737_v18 = vmul.f32 %v4735_v15, %v4735_v15 }
 0x429   : > { %v4738_v19 = vsel %vm297_vm3, %v4736_v17, 0.0  ;;  %v4739_v20 = vsel %vm297_vm3, %v4737_v18, 0.0 }
 0x42a   : > { %v4740_v21 = vadd.f32 %v4739_v20, %v4738_v19 }
 0x42c   : > { %4741 = vadd.xlane.f32.xlu0 %v4740_v21 }
 0x4b9   : > { %v4742_v24 = vpop.xlane.xlu0 %4741 }
 0x4ba   : > { %v4743_v25 = vmul.f32 0.00390625, %v4742_v24 }
 0x4bc   : > { %v4744_v26 = vadd.f32 1e-05, %v4743_v25 }
 0x4be   : > { %9562 = vrsqrt.f32 %v4744_v26 }
 0x4c8   : > { %v9563_v29 = vpop.eup %9562 }
 0x4c9   : > { %v4746_v9 = vmul.f32 %v9563_v29, %v4734_v14  ;;  %v4747_v31 = vmul.f32 %v9563_v29, %v4735_v15 }
 0x4cb   : > { %v4748_v32 = vmax.f32 %v4746_v9, 0.0  ;;  %v4749_v34 = vmax.f32 %v4747_v31, 0.0 }
 0x4cd   : > { %v10024_v16 = vcombine.low %v4748_v32, %v4749_v34  ;;  %v10055_v51 = vcombine.low %v4749_v34, %v4749_v34  ;;  %v4759_v32 = vld [vmem:[%s10260_s3] sm:$0xf] }
 0x4cf   : > { %4754 = vst [vmem:[#allocation2 + $0x4] sm:$0xff] %v10024_v16  ;;  %v7191_v46 = vmul.f32 %v10024_v16, %v9879_v4  ;;  %v7683_v4 = vmul.f32 %v7681_v50, %v9888_v13  ;;  %v8172_v13 = vld [vmem:[#allocation2 + $0xc] sm:$0xf] }
 0x4d1   : > { %v7197_v48 = vcombine.high %v7191_v46, %v7191_v46 }
 0x4d6   : > { %v4756_v35 = vld [vmem:[#allocation2 + $0x8] sm:$0xf]  ;;  %v4755_v36 = vld [vmem:[#allocation2] sm:$0xff] }
 0x4d7   : > { %4769 = vrot.lane.b32.xlu0 %v4756_v35, %s9633_s19  ;;  %v4764_v37 = vcombine.high %v4755_v36, %v4755_v36  ;;  %v4758_v38 = vmul.f32 %v4756_v35, %v9768_v22  ;;  %v5730_v39 = vmul.f32 %v4755_v36, %v9792_v43  ;;  %v4757_v40 = vmul.f32 %v4755_v36, %v9772_v23  ;;  %v6220_v45 = vld [vmem:[#allocation2 + $0x8] sm:$0xf] }
 0x4d8   : > { %v5729_v22 = vld [vmem:[#allocation2 + $0x8] sm:$0xf]  ;;  %v6222_v43 = vmul.f32 %v6220_v45, %v9819_v2  ;;  %v6221_v47 = vmul.f32 %v4755_v36, %v9823_v5  ;;  %v7190_v2 = vld [vmem:[#allocation2 + $0xc] sm:$0xf]  ;;  %v7682_v5 = vmul.f32 %v10024_v16, %v9892_v27  ;;  %v8662_v27 = vmul.f32 %v10024_v16, %v9954_v30 }
 0x4d9   : > { %4767 = vrot.lane.b32.xlu1 %v4764_v37, %s9633_s19  ;;  %v5736_v42 = vcombine.high %v5730_v39, %v5730_v39  ;;  %v5247_v44 = vcombine.high %v4757_v40, %v4757_v40  ;;  %v5731_v23 = vmul.f32 %v5729_v22, %v9788_v41  ;;  %v7192_v41 = vmul.f32 %v7190_v2, %v9872_v63 }
 0x4da   : > { %v6227_v49 = vcombine.high %v6221_v47, %v6221_v47  ;;  %v7688_v52 = vcombine.high %v7682_v5, %v7682_v5  ;;  %v8663_v63 = vmul.f32 %v8661_v53, %v9950_v28  ;;  %v8668_v54 = vcombine.high %v8662_v27, %v8662_v27  ;;  %v9281_v28 = vld [vmem:[%s10260_s3 + $0x4] sm:$0xf]  ;;  %v9282_v53 = vld [vmem:[%s10260_s3 + $0x8] sm:$0xf] }
 0x4db   : > { %5252 = vrot.lane.b32.xlu0 %v4758_v38, %s9635_s29  ;;  %v4774_v56 = vsel %vm293_vm0, %v9281_v28, 0 }
 0x4dc   : > { %v10077_v58 = vand.u32 4294901760, %v4774_v56 }
 0x4dd   : > { %4765 = vrot.lane.b32.xlu1 %v4755_v36, %s9633_s19  ;;  %v5257_v36 = vsel %vm293_vm0, %v4759_v32, 0 }
 0x4de   : > { %v4848_v30 = vsub.f32 %v4774_v56, %v10077_v58 }
 0x4df   : > { %5739 = vrot.lane.b32.xlu0 %v5736_v42, %s9637_s10 }
 0x4e0   : > { %v4849_v59 = vand.u32 4294901760, %v4848_v30 }
 0x4e1   : > { %5250 = vrot.lane.b32.xlu1 %v5247_v44, %s9635_s29 }
 0x4e2   : > { %v4850_v0 = vsub.f32 %v4848_v30, %v4849_v59 }
 0x4e3   : > { %5737 = vrot.lane.b32.xlu0 %v5730_v39, %s9637_s10  ;;  %v5330_v39 = vand.u32 4294901760, %v5257_v36 }
 0x4e4   : > { %v4851_v12 = vand.u32 4294901760, %v4850_v0 }
 0x4e5   : > { %5248 = vrot.lane.b32.xlu1 %v4757_v40, %s9635_s29  ;;  %v5331_v44 = vsub.f32 %v5257_v36, %v5330_v39 }
 0x4e7   : > { %6232 = vrot.lane.b32.xlu0 %v6222_v43, %s9638_s13  ;;  %v5332_v43 = vand.u32 4294901760, %v5331_v44 }
 0x4e9   : > { %5741 = vrot.lane.b32.xlu1 %v5731_v23, %s9637_s10  ;;  %s242_s10 = sand.u32 1, %s9621_s22  }
 0x4ea   : > { %s9192_s14 = scalar_lea.sflag [#allocation4], %s242_s10 }
 0x4eb   : > { %7200 = vrot.lane.b32.xlu0 %v7197_v48, %s9636_s9 }
 0x4ed   : > { %6230 = vrot.lane.b32.xlu1 %v6227_v49, %s9638_s13 }
 0x4ef   : > { %7198 = vrot.lane.b32.xlu0 %v7191_v46, %s9636_s9 }
 0x4f1   : > { %6228 = vrot.lane.b32.xlu1 %v6221_v47, %s9638_s13  ;;  %v5333_v47 = vsub.f32 %v5331_v44, %v5332_v43  ;;  %s9269_s13 = sshll.u32 %s242_s10, 3 }
 0x4f2   : > { %s244_s17 = scalar_lea.vmem [#allocation3], %s9269_s13 }
 0x4f3   : > { %7693 = vrot.lane.b32.xlu0 %v7683_v4, %s9634_s20  ;;  %v5334_v49 = vand.u32 4294901760, %v5333_v47  ;;  %s9206_s18 = sshll.u32 %s244_s17, 4  ;;  %s10217_s18 = int_to_ptr.vmem [resolvable:$true] %s9206_s18 }
 0x4f4   : > { %s9567_s15 = scalar_lea.vmem %s10217_s18, 128 }
 0x4f5   : > { %7202 = vrot.lane.b32.xlu1 %v7192_v41, %s9636_s9  ;;  %p9568_p11 = scmp.ne.s32.totalorder %s10217_s18, %s9567_s15 }
 0x4f7   : > { %8180 = vrot.lane.b32.xlu0 %v10055_v51, %s9639_s26  ;;  %p9569_p12 = pnand %p9568_p11, %p9715_p5 }
 0x4f9   : > { %7691 = vrot.lane.b32.xlu1 %v7688_v52, %s9634_s20  ;;  %p9570_p13 = pneg %p9569_p12 }
 0x4fb   : > { %8178 = vrot.lane.b32.xlu0 %v10024_v16, %s9639_s26 }
 0x4fd   : > { %7689 = vrot.lane.b32.xlu1 %v7682_v5, %s9634_s20 }
 0x4ff   : > { %8673 = vrot.lane.b32.xlu0 %v8663_v63, %s9632_s16 }
 0x501   : > { %8182 = vrot.lane.b32.xlu1 %v8172_v13, %s9639_s26  ;;  %s9295_s26 = sshll.u32 %s9698_s25, 7  ;;  %s9641_s25 = smov [#allocation3]  }
 0x502   : > { %s10215_s12 = scalar_lea.hbm %s10263_s6, %s9295_s26  ;;  %s9571_s19 = sshll.u32 %s9641_s25, 4  ;;  %s9572_s19 = int_to_ptr.vmem [resolvable:$false] %s9571_s19 }
 0x503   : > { %9154 = vperm.xlu0 %9557, %v9151_v55   ;;  %s9573_s29 = scalar_lea.vmem %s9572_s19, 256  ;;  %p9574_p0 = scmp.lt.s32.totalorder %s10217_s18, %s9572_s19 }
 0x504   : > { %p9575_p1 = scmp.lt.s32.totalorder %s9573_s29, %s9567_s15 }
 0x505   : > { %8671 = vrot.lane.b32.xlu1 %v8668_v54, %s9632_s16 }
 0x506   : > { %p9576_p2 = por %p9575_p1, %p9574_p0 }
 0x508   : > { %p9577_p3 = pnand %p9576_p2, %p9570_p13 }
 0x509   : > { %8669 = vrot.lane.b32.xlu1 %v8662_v27, %s9632_s16  ;;  %v5746_v27 = vsel %vm293_vm0, %v9282_v53, 0 }
 0x50a   : > { %v5819_v28 = vand.u32 4294901760, %v5746_v27 }
 0x549   : > { %v4770_v57 = vpop.permute.xlu0 %4769 }
 0x54b   : > { %v4768_v60 = vpop.permute.xlu1 %4767 }
 0x54c   : > { %v4772_v61 = vsel %vm290_vm2, %v4768_v60, %v4770_v57 }
 0x54d   : > { %v4778_v62 = vsel %vm297_vm3, %v4772_v61, 0  ;;  %v5253_v26 = vpop.permute.xlu0 %5252 }
 0x54e   : > { %v4780_v3 = vand.u32 4294901760, %v4778_v62 }
 0x54f   : > { %v4766_v6 = vpop.permute.xlu1 %4765 }
 0x550   : > { %v4859_v7 = vsub.f32 %v4778_v62, %v4780_v3  ;;  %v4771_v10 = vsel %vm290_vm2, %v4766_v6, %v4768_v60  ;;  %4781 = vmatprep.subr.mxu1 %v4780_v3 }
 0x551   : > { %v4776_v11 = vsel %vm297_vm3, %v4771_v10, 0  ;;  %v5740_v4 = vpop.permute.xlu0 %5739 }
 0x552   : > { %v4782_v14 = vand.u32 4294901760, %v4776_v11  ;;  %v4860_v15 = vand.u32 4294901760, %v4859_v7 }
 0x553   : > { %v5251_v25 = vpop.permute.xlu1 %5250 }
 0x554   : > { %v4865_v17 = vsub.f32 %v4776_v11, %v4782_v14  ;;  %4783 = vmatpush1.msra.mxu1 %v4782_v14  ;;  %v4861_v18 = vsub.f32 %v4859_v7, %v4860_v15  ;;  %v5255_v29 = vsel %vm776_vm5, %v5251_v25, %v5253_v26 }
 0x555   : > { %4852 = vmatmul.mubr.f32.vlgmr.msra.gmra.mrb[0].mxu1 %v4851_v12  ;;  %v5261_v9 = vsel %vm297_vm3, %v5255_v29, 0  ;;  %v5738_v52 = vpop.permute.xlu0 %5737 }
 0x556   : > { %v4866_v19 = vand.u32 4294901760, %v4865_v17  ;;  %v4862_v20 = vand.u32 4294901760, %v4861_v18  ;;  %4932 = vmatprep.mubr.f32.mxu1 %v9631_v1  ;;  %v5263_v34 = vand.u32 4294901760, %v5261_v9  ;;  %v5743_v13 = vsel %vm1283_vm7, %v5738_v52, %v5740_v4 }
 0x557   : > { %v5249_v31 = vpop.permute.xlu1 %5248  ;;  %v5748_v55 = vsel %vm297_vm3, %v5743_v13, 0 }
 0x558   : > { %4863 = vmatprep.subr.mxu1 %v4862_v20  ;;  %v4867_v21 = vsub.f32 %v4865_v17, %v4866_v19  ;;  %v5254_v35 = vsel %vm776_vm5, %v5249_v31, %v5251_v25  ;;  %v5342_v37 = vsub.f32 %v5261_v9, %v5263_v34  ;;  %v5754_v56 = vand.u32 4294901760, %v5748_v55 }
 0x559   : > { %v5259_v38 = vsel %vm297_vm3, %v5254_v35, 0  ;;  %v6233_v11 = vpop.permute.xlu0 %6232 }
 0x55a   : > { %v4868_v24 = vand.u32 4294901760, %v4867_v21  ;;  %v5265_v40 = vand.u32 4294901760, %v5259_v38  ;;  %v5343_v42 = vand.u32 4294901760, %v5342_v37 }
 0x55b   : > { %v5742_v2 = vpop.permute.xlu1 %5741 }
 0x55c   : > { %4869 = vmatpush1.msra.mxu1 %v4868_v24  ;;  %v5348_v45 = vsub.f32 %v5259_v38, %v5265_v40  ;;  %v5344_v22 = vsub.f32 %v5342_v37, %v5343_v42  ;;  %v5744_v41 = vsel %vm1283_vm7, %v5740_v4, %v5742_v2 }
 0x55d   : > { %4934 = vmatmul.mubr.f32.vlgmr.msra.gmra.mrb[0].mxu1 %v10077_v58  ;;  %4942 = vmatprep.subr.mxu1 %v4859_v7  ;;  %v5750_v5 = vsel %vm297_vm3, %v5744_v41, 0  ;;  %v7201_v13 = vpop.permute.xlu0 %7200 }
 0x55e   : > { %4945 = vmatpush1.msra.mxu1 %v4865_v17  ;;  %5008 = vmatprep.mubr.f32.mxu1 %v9631_v1  ;;  %v5349_v46 = vand.u32 4294901760, %v5348_v45  ;;  %v5345_v23 = vand.u32 4294901760, %v5344_v22  ;;  %v5752_v63 = vand.u32 4294901760, %v5750_v5  ;;  %v9283_v17 = vld [vmem:[%s10260_s3 + $0xc] sm:$0xf] }
 0x55f   : > { %5018 = vmatprep.subr.mxu1 %v4780_v3  ;;  %v6231_v10 = vpop.permute.xlu1 %6230  ;;  %v6237_v20 = vsel %vm293_vm0, %v9283_v17, 0 }
 0x560   : > { %v5350_v48 = vsub.f32 %v5348_v45, %v5349_v46  ;;  %v5831_v54 = vsub.f32 %v5750_v5, %v5752_v63  ;;  %v6235_v12 = vsel %vm1782_vm8, %v6231_v10, %v6233_v11  ;;  %v6310_v25 = vand.u32 4294901760, %v6237_v20 }
 0x562   : > { %v5351_v50 = vand.u32 4294901760, %v5350_v48  ;;  %v6311_v9 = vsub.f32 %v6237_v20, %v6310_v25 }
 0x565   : > { %5011 = vmatmul.mubr.f32.vlgmr.msra.gmra.mrb[0].mxu1 %v4848_v30  ;;  %v5820_v30 = vsub.f32 %v5746_v27, %v5819_v28 }
 0x566   : > { %5020 = vmatpush1.msra.mxu1 %v4782_v14  ;;  %5083 = vmatprep.mubr.f32.mxu1 %v9631_v1 }
 0x567   : > { %5096 = vmatprep.subr.mxu1 %v4860_v15  ;;  %v5821_v60 = vand.u32 4294901760, %v5820_v30  ;;  %v6229_v15 = vpop.permute.xlu1 %6228 }
 0x569   : > { %v5822_v0 = vsub.f32 %v5820_v30, %v5821_v60 }
 0x56b   : > { %v5823_v6 = vand.u32 4294901760, %v5822_v0 }
 0x56d   : > { %5087 = vmatmul.mubr.f32.vlgmr.msra.gmra.mrb[0].mxu1 %v4849_v59  ;;  %v5837_v59 = vsub.f32 %v5748_v55, %v5754_v56 }
 0x56e   : > { %5100 = vmatpush1.msra.mxu1 %v4866_v19  ;;  %5163 = vmatprep.mubr.f32.mxu1 %v9631_v1  ;;  %v6234_v19 = vsel %vm1782_vm8, %v6229_v15, %v6231_v10 }
 0x56f   : > { %5172 = vmatprep.subr.mxu1 %v4780_v3  ;;  %v5838_v61 = vand.u32 4294901760, %v5837_v59  ;;  %v6239_v24 = vsel %vm297_vm3, %v6234_v19, 0 }
 0x570   : > { %v6245_v26 = vand.u32 4294901760, %v6239_v24 }
 0x571   : > { %v5839_v3 = vsub.f32 %v5837_v59, %v5838_v61 }
 0x572   : > { %v6328_v31 = vsub.f32 %v6239_v24, %v6245_v26 }
 0x573   : > { %v5840_v7 = vand.u32 4294901760, %v5839_v3 }
 0x574   : > { %v6329_v35 = vand.u32 4294901760, %v6328_v31 }
 0x575   : > { %5165 = vmatmul.mubr.f32.vlgmr.msra.gmra.mrb[0].mxu1 %v10077_v58 }
 0x576   : > { %5174 = vmatpush1.msra.mxu1 %v4782_v14  ;;  %5237 = vmatprep.mubr.f32.mxu1 %v9631_v1  ;;  %v6241_v14 = vsel %vm297_vm3, %v6235_v12, 0  ;;  %v6330_v38 = vsub.f32 %v6328_v31, %v6329_v35 }
 0x577   : > { %5264 = vmatprep.subr.mxu1 %v5263_v34  ;;  %v6243_v18 = vand.u32 4294901760, %v6241_v14 }
 0x579   : > { %v6322_v21 = vsub.f32 %v6241_v14, %v6243_v18 }
 0x57b   : > { %v6323_v29 = vand.u32 4294901760, %v6322_v21 }
 0x57d   : > { %5239 = vmatmul.mubr.f32.vlgmr.msra.gmra.mrb[0].mxu1 %v10077_v58  ;;  %v5832_v58 = vand.u32 4294901760, %v5831_v54  ;;  %v6324_v32 = vsub.f32 %v6322_v21, %v6323_v29 }
 0x57e   : > { %5266 = vmatpush1.msra.mxu1 %v5265_v40  ;;  %5329 = vmatprep.mubr.f32.mxu1 %v9631_v1 }
 0x57f   : > { %5346 = vmatprep.subr.mxu1 %v5345_v23  ;;  %v5833_v57 = vsub.f32 %v5831_v54, %v5832_v58  ;;  %v6325_v36 = vand.u32 4294901760, %v6324_v32 }
 0x581   : > { %v5834_v62 = vand.u32 4294901760, %v5833_v57 }
 0x585   : > { %5335 = vmatmul.mubr.f32.vlgmr.msra.gmra.mrb[0].mxu1 %v5334_v49 }
 0x586   : > { %5352 = vmatpush1.msra.mxu1 %v5351_v50  ;;  %5415 = vmatprep.mubr.f32.mxu1 %v9631_v1 }
 0x587   : > { %5425 = vmatprep.subr.mxu1 %v5342_v37 }
 0x58d   : > { %5417 = vmatmul.mubr.f32.vlgmr.msra.gmra.mrb[0].mxu1 %v5330_v39 }
 0x58e   : > { %5428 = vmatpush1.msra.mxu1 %v5348_v45  ;;  %5491 = vmatprep.mubr.f32.mxu1 %v9631_v1 }
 0x58f   : > { %5501 = vmatprep.subr.mxu1 %v5263_v34 }
 0x595   : > { %5494 = vmatmul.mubr.f32.vlgmr.msra.gmra.mrb[0].mxu1 %v5331_v44  ;;  %v9284_v44 = vld [vmem:[%s10260_s3 + $0x10] sm:$0xf] }
 0x596   : > { %5503 = vmatpush1.msra.mxu1 %v5265_v40  ;;  %5566 = vmatprep.mubr.f32.mxu1 %v9631_v1  ;;  %v6716_v22 = vsel %vm293_vm0, %v9284_v44, 0 }
 0x597   : > { %5579 = vmatprep.subr.mxu1 %v5343_v42  ;;  %v6720_v42 = vsel %vm297_vm3, %v10055_v51, 0  ;;  %v6789_v23 = vand.u32 4294901760, %v6716_v22 }
 0x598   : > { %v6722_v45 = vand.u32 4294901760, %v6720_v42 }
 0x599   : > { %v6790_v48 = vsub.f32 %v6716_v22, %v6789_v23 }
 0x59b   : > { %v6791_v2 = vand.u32 4294901760, %v6790_v48 }
 0x59d   : > { %5570 = vmatmul.mubr.f32.vlgmr.msra.gmra.mrb[0].mxu1 %v5332_v43  ;;  %v6718_v43 = vsel %vm297_vm3, %v10024_v16, 0  ;;  %v6792_v5 = vsub.f32 %v6790_v48, %v6791_v2 }
 0x59e   : > { %5583 = vmatpush1.msra.mxu1 %v5349_v46  ;;  %5646 = vmatprep.mubr.f32.mxu1 %v9631_v1  ;;  %v6801_v46 = vsub.f32 %v6720_v42, %v6722_v45  ;;  %v6724_v47 = vand.u32 4294901760, %v6718_v43 }
 0x59f   : > { %5655 = vmatprep.subr.mxu1 %v5263_v34  ;;  %v6312_v34 = vand.u32 4294901760, %v6311_v9  ;;  %v6793_v52 = vand.u32 4294901760, %v6792_v5 }
 0x5a0   : > { %v6802_v51 = vand.u32 4294901760, %v6801_v46  ;;  %v6807_v49 = vsub.f32 %v6718_v43, %v6724_v47 }
 0x5a1   : > { %v6313_v37 = vsub.f32 %v6311_v9, %v6312_v34 }
 0x5a2   : > { %v6803_v50 = vsub.f32 %v6801_v46, %v6802_v51  ;;  %v6808_v4 = vand.u32 4294901760, %v6807_v49 }
 0x5a4   : > { %v6804_v41 = vand.u32 4294901760, %v6803_v50  ;;  %v6809_v16 = vsub.f32 %v6807_v49, %v6808_v4  ;;  %v9287_v50 = vld [vmem:[%s10260_s3 + $0x1c] sm:$0xf] }
 0x5a5   : > { %5648 = vmatmul.mubr.f32.vlgmr.msra.gmra.mrb[0].mxu1 %v5330_v39 }
 0x5a6   : > { %5657 = vmatpush1.msra.mxu1 %v5265_v40  ;;  %5720 = vmatprep.mubr.f32.mxu1 %v9631_v1  ;;  %v6331_v40 = vand.u32 4294901760, %v6330_v38  ;;  %v6810_v53 = vand.u32 4294901760, %v6809_v16 }
 0x5a7   : > { %5753 = vmatprep.subr.mxu1 %v5752_v63 }
 0x5ad   : > { %5722 = vmatmul.mubr.f32.vlgmr.msra.gmra.mrb[0].mxu1 %v5330_v39  ;;  %v6314_v39 = vand.u32 4294901760, %v6313_v37 }
 0x5ae   : > { %5755 = vmatpush1.msra.mxu1 %v5754_v56  ;;  %5818 = vmatprep.mubr.f32.mxu1 %v9631_v1 }
 0x5af   : > { %5835 = vmatprep.subr.mxu1 %v5834_v62 }
 0x5b5   : > { %5824 = vmatmul.mubr.f32.vlgmr.msra.gmra.mrb[0].mxu1 %v5823_v6 }
 0x5b6   : > { %5841 = vmatpush1.msra.mxu1 %v5840_v7  ;;  %5904 = vmatprep.mubr.f32.mxu1 %v9631_v1 }
 0x5b7   : > { %5914 = vmatprep.subr.mxu1 %v5831_v54  ;;  %v7199_v54 = vpop.permute.xlu0 %7198 }
 0x5bb   : > { %v7694_v19 = vpop.permute.xlu0 %7693 }
 0x5bd   : > { %5906 = vmatmul.mubr.f32.vlgmr.msra.gmra.mrb[0].mxu1 %v5819_v28 }
 0x5be   : > { %5917 = vmatpush1.msra.mxu1 %v5837_v59  ;;  %5980 = vmatprep.mubr.f32.mxu1 %v9631_v1 }
 0x5bf   : > { %5990 = vmatprep.subr.mxu1 %v5752_v63 }
 0x5c5   : > { %5983 = vmatmul.mubr.f32.vlgmr.msra.gmra.mrb[0].mxu1 %v5820_v30 }
 0x5c6   : > { %5992 = vmatpush1.msra.mxu1 %v5754_v56  ;;  %6055 = vmatprep.mubr.f32.mxu1 %v9631_v1 }
 0x5c7   : > { %6068 = vmatprep.subr.mxu1 %v5832_v58  ;;  %v7204_v58 = vsel %vm1765_vm6, %v7199_v54, %v7201_v13 }
 0x5c8   : > { %v7209_v59 = vsel %vm297_vm3, %v7204_v58, 0 }
 0x5cd   : > { %6059 = vmatmul.mubr.f32.vlgmr.msra.gmra.mrb[0].mxu1 %v5821_v60 }
 0x5ce   : > { %6072 = vmatpush1.msra.mxu1 %v5838_v61  ;;  %6135 = vmatprep.mubr.f32.mxu1 %v9631_v1  ;;  %v7215_v61 = vand.u32 4294901760, %v7209_v59 }
 0x5cf   : > { %6144 = vmatprep.subr.mxu1 %v5752_v63  ;;  %v7203_v63 = vpop.permute.xlu1 %7202 }
 0x5d0   : > { %v7205_v27 = vsel %vm1765_vm6, %v7201_v13, %v7203_v63  ;;  %v7298_v3 = vsub.f32 %v7209_v59, %v7215_v61 }
 0x5d1   : > { %v7211_v55 = vsel %vm297_vm3, %v7205_v27, 0 }
 0x5d2   : > { %v7299_v10 = vand.u32 4294901760, %v7298_v3 }
 0x5d4   : > { %v7300_v14 = vsub.f32 %v7298_v3, %v7299_v10 }
 0x5d5   : > { %6137 = vmatmul.mubr.f32.vlgmr.msra.gmra.mrb[0].mxu1 %v5819_v28 }
 0x5d6   : > { %6146 = vmatpush1.msra.mxu1 %v5754_v56  ;;  %6209 = vmatprep.mubr.f32.mxu1 %v9631_v1  ;;  %v7213_v56 = vand.u32 4294901760, %v7211_v55  ;;  %v7301_v17 = vand.u32 4294901760, %v7300_v14 }
 0x5d7   : > { %6244 = vmatprep.subr.mxu1 %v6243_v18 }
 0x5d8   : > { %v7292_v57 = vsub.f32 %v7211_v55, %v7213_v56 }
 0x5da   : > { %v7293_v62 = vand.u32 4294901760, %v7292_v57 }
 0x5dc   : > { %v7294_v6 = vsub.f32 %v7292_v57, %v7293_v62 }
 0x5dd   : > { %6211 = vmatmul.mubr.f32.vlgmr.msra.gmra.mrb[0].mxu1 %v5819_v28  ;;  %v9285_v28 = vld [vmem:[%s10260_s3 + $0x14] sm:$0xf] }
 0x5de   : > { %6246 = vmatpush1.msra.mxu1 %v6245_v26  ;;  %6309 = vmatprep.mubr.f32.mxu1 %v9631_v1  ;;  %v7207_v30 = vsel %vm293_vm0, %v9285_v28, 0  ;;  %v7295_v11 = vand.u32 4294901760, %v7294_v6  ;;  %v9288_v6 = vld [vmem:[%s10260_s3 + $0x20] sm:$0xf] }
 0x5df   : > { %6326 = vmatprep.subr.mxu1 %v6325_v36  ;;  %v7280_v60 = vand.u32 4294901760, %v7207_v30 }
 0x5e1   : > { %v7281_v0 = vsub.f32 %v7207_v30, %v7280_v60 }
 0x5e3   : > { %v7282_v7 = vand.u32 4294901760, %v7281_v0 }
 0x5e5   : > { %6315 = vmatmul.mubr.f32.vlgmr.msra.gmra.mrb[0].mxu1 %v6314_v39  ;;  %v7283_v12 = vsub.f32 %v7281_v0, %v7282_v7 }
 0x5e6   : > { %6332 = vmatpush1.msra.mxu1 %v6331_v40  ;;  %6395 = vmatprep.mubr.f32.mxu1 %v9631_v1 }
 0x5e7   : > { %6405 = vmatprep.subr.mxu1 %v6322_v21  ;;  %v7284_v15 = vand.u32 4294901760, %v7283_v12 }
 0x5ed   : > { %6397 = vmatmul.mubr.f32.vlgmr.msra.gmra.mrb[0].mxu1 %v6310_v25 }
 0x5ee   : > { %6408 = vmatpush1.msra.mxu1 %v6328_v31  ;;  %6471 = vmatprep.mubr.f32.mxu1 %v9631_v1 }
 0x5ef   : > { %6481 = vmatprep.subr.mxu1 %v6243_v18 }
 0x5f5   : > { %6474 = vmatmul.mubr.f32.vlgmr.msra.gmra.mrb[0].mxu1 %v6311_v9 }
 0x5f6   : > { %6483 = vmatpush1.msra.mxu1 %v6245_v26  ;;  %6546 = vmatprep.mubr.f32.mxu1 %v9631_v1 }
 0x5f7   : > { %6559 = vmatprep.subr.mxu1 %v6323_v29 }
 0x5fd   : > { %6550 = vmatmul.mubr.f32.vlgmr.msra.gmra.mrb[0].mxu1 %v6312_v34 }
 0x5fe   : > { %6563 = vmatpush1.msra.mxu1 %v6329_v35  ;;  %6626 = vmatprep.mubr.f32.mxu1 %v9631_v1 }
 0x5ff   : > { %6635 = vmatprep.subr.mxu1 %v6243_v18  ;;  %v7692_v18 = vpop.permute.xlu1 %7691 }
 0x600   : > { %v7696_v20 = vsel %vm1266_vm4, %v7692_v18, %v7694_v19 }
 0x601   : > { %v7702_v21 = vsel %vm297_vm3, %v7696_v20, 0 }
 0x603   : > { %v7690_v24 = vpop.permute.xlu1 %7689 }
 0x604   : > { %v7695_v29 = vsel %vm1266_vm4, %v7690_v24, %v7692_v18 }
 0x605   : > { %6628 = vmatmul.mubr.f32.vlgmr.msra.gmra.mrb[0].mxu1 %v6310_v25  ;;  %v7700_v32 = vsel %vm297_vm3, %v7695_v29, 0 }
 0x606   : > { %6637 = vmatpush1.msra.mxu1 %v6245_v26  ;;  %6700 = vmatprep.mubr.f32.mxu1 %v9631_v1  ;;  %v7704_v26 = vand.u32 4294901760, %v7702_v21  ;;  %v7706_v35 = vand.u32 4294901760, %v7700_v32 }
 0x607   : > { %6723 = vmatprep.subr.mxu1 %v6722_v45 }
 0x608   : > { %v7783_v31 = vsub.f32 %v7702_v21, %v7704_v26  ;;  %v7789_v38 = vsub.f32 %v7700_v32, %v7706_v35 }
 0x60a   : > { %v7784_v36 = vand.u32 4294901760, %v7783_v31  ;;  %v7790_v42 = vand.u32 4294901760, %v7789_v38 }
 0x60c   : > { %v7785_v39 = vsub.f32 %v7783_v31, %v7784_v36  ;;  %v7791_v22 = vsub.f32 %v7789_v38, %v7790_v42 }
 0x60d   : > { %6702 = vmatmul.mubr.f32.vlgmr.msra.gmra.mrb[0].mxu1 %v6310_v25  ;;  %v9286_v25 = vld [vmem:[%s10260_s3 + $0x18] sm:$0xf] }
 0x60e   : > { %6725 = vmatpush1.msra.mxu1 %v6724_v47  ;;  %6788 = vmatprep.mubr.f32.mxu1 %v9631_v1  ;;  %v7698_v9 = vsel %vm293_vm0, %v9286_v25, 0  ;;  %v7786_v44 = vand.u32 4294901760, %v7785_v39 }
 0x60f   : > { %6805 = vmatprep.subr.mxu1 %v6804_v41  ;;  %v7771_v34 = vand.u32 4294901760, %v7698_v9  ;;  %v8187_v41 = vsel %vm293_vm0, %v9287_v50, 0 }
 0x611   : > { %v7772_v37 = vsub.f32 %v7698_v9, %v7771_v34 }
 0x613   : > { %v7773_v40 = vand.u32 4294901760, %v7772_v37 }
 0x615   : > { %6794 = vmatmul.mubr.f32.vlgmr.msra.gmra.mrb[0].mxu1 %v6793_v52  ;;  %v8260_v52 = vand.u32 4294901760, %v8187_v41 }
 0x616   : > { %6811 = vmatpush1.msra.mxu1 %v6810_v53  ;;  %6874 = vmatprep.mubr.f32.mxu1 %v9631_v1 }
 0x617   : > { %6884 = vmatprep.subr.mxu1 %v6801_v46  ;;  %v7792_v46 = vand.u32 4294901760, %v7791_v22  ;;  %v8261_v13 = vsub.f32 %v8187_v41, %v8260_v52 }
 0x619   : > { %v8262_v54 = vand.u32 4294901760, %v8261_v13 }
 0x61b   : > { %v8263_v58 = vsub.f32 %v8261_v13, %v8262_v54 }
 0x61d   : > { %6876 = vmatmul.mubr.f32.vlgmr.msra.gmra.mrb[0].mxu1 %v6789_v23  ;;  %v8264_v59 = vand.u32 4294901760, %v8263_v58 }
 0x61e   : > { %6887 = vmatpush1.msra.mxu1 %v6807_v49  ;;  %6950 = vmatprep.mubr.f32.mxu1 %v9631_v1 }
 0x61f   : > { %6960 = vmatprep.subr.mxu1 %v6722_v45 }
 0x625   : > { %6953 = vmatmul.mubr.f32.vlgmr.msra.gmra.mrb[0].mxu1 %v6790_v48 }
 0x626   : > { %6962 = vmatpush1.msra.mxu1 %v6724_v47  ;;  %7025 = vmatprep.mubr.f32.mxu1 %v9631_v1 }
 0x627   : > { %7038 = vmatprep.subr.mxu1 %v6802_v51 }
 0x62d   : > { %7029 = vmatmul.mubr.f32.vlgmr.msra.gmra.mrb[0].mxu1 %v6791_v2 }
 0x62e   : > { %7042 = vmatpush1.msra.mxu1 %v6808_v4  ;;  %7105 = vmatprep.mubr.f32.mxu1 %v9631_v1 }
 0x62f   : > { %7114 = vmatprep.subr.mxu1 %v6722_v45  ;;  %v7774_v45 = vsub.f32 %v7772_v37, %v7773_v40 }
 0x631   : > { %v7775_v43 = vand.u32 4294901760, %v7774_v45 }
 0x635   : > { %7107 = vmatmul.mubr.f32.vlgmr.msra.gmra.mrb[0].mxu1 %v6789_v23 }
 0x636   : > { %7116 = vmatpush1.msra.mxu1 %v6724_v47  ;;  %7179 = vmatprep.mubr.f32.mxu1 %v9631_v1  ;;  %v8181_v47 = vpop.permute.xlu0 %8180 }
 0x637   : > { %7214 = vmatprep.subr.mxu1 %v7213_v56 }
 0x63a   : > { %v8179_v49 = vpop.permute.xlu0 %8178 }
 0x63b   : > { %v8184_v4 = vsel %vm3745_vm9, %v8179_v49, %v8181_v47 }
 0x63c   : > { %v8189_v5 = vsel %vm297_vm3, %v8184_v4, 0 }
 0x63d   : > { %7181 = vmatmul.mubr.f32.vlgmr.msra.gmra.mrb[0].mxu1 %v6789_v23  ;;  %v8183_v23 = vpop.permute.xlu1 %8182  ;;  %v8195_v53 = vand.u32 4294901760, %v8189_v5 }
 0x63e   : > { %7216 = vmatpush1.msra.mxu1 %v7215_v61  ;;  %7279 = vmatprep.mubr.f32.mxu1 %v9631_v1  ;;  %v8185_v51 = vsel %vm3745_vm9, %v8181_v47, %v8183_v23 }
 0x63f   : > { %7296 = vmatprep.subr.mxu1 %v7295_v11  ;;  %v8191_v48 = vsel %vm297_vm3, %v8185_v51, 0  ;;  %v8278_v27 = vsub.f32 %v8189_v5, %v8195_v53  ;;  %v8678_v11 = vsel %vm293_vm0, %v9288_v6, 0 }
 0x640   : > { %v8193_v2 = vand.u32 4294901760, %v8191_v48 }
 0x641   : > { %v8279_v28 = vand.u32 4294901760, %v8278_v27 }
 0x642   : > { %v8272_v16 = vsub.f32 %v8191_v48, %v8193_v2 }
 0x643   : > { %v8280_v30 = vsub.f32 %v8278_v27, %v8279_v28 }
 0x644   : > { %v8273_v63 = vand.u32 4294901760, %v8272_v16 }
 0x645   : > { %7285 = vmatmul.mubr.f32.vlgmr.msra.gmra.mrb[0].mxu1 %v7284_v15  ;;  %v8751_v15 = vand.u32 4294901760, %v8678_v11 }
 0x646   : > { %7302 = vmatpush1.msra.mxu1 %v7301_v17  ;;  %7365 = vmatprep.mubr.f32.mxu1 %v9631_v1  ;;  %v8274_v55 = vsub.f32 %v8272_v16, %v8273_v63 }
 0x647   : > { %7375 = vmatprep.subr.mxu1 %v7292_v57  ;;  %v8281_v57 = vand.u32 4294901760, %v8280_v30  ;;  %v8752_v19 = vsub.f32 %v8678_v11, %v8751_v15 }
 0x649   : > { %v8753_v24 = vand.u32 4294901760, %v8752_v19 }
 0x64b   : > { %v8754_v29 = vsub.f32 %v8752_v19, %v8753_v24 }
 0x64d   : > { %7367 = vmatmul.mubr.f32.vlgmr.msra.gmra.mrb[0].mxu1 %v7280_v60 }
 0x64e   : > { %7378 = vmatpush1.msra.mxu1 %v7298_v3  ;;  %7441 = vmatprep.mubr.f32.mxu1 %v9631_v1 }
 0x64f   : > { %7451 = vmatprep.subr.mxu1 %v7213_v56 }
 0x655   : > { %7444 = vmatmul.mubr.f32.vlgmr.msra.gmra.mrb[0].mxu1 %v7281_v0 }
 0x656   : > { %7453 = vmatpush1.msra.mxu1 %v7215_v61  ;;  %7516 = vmatprep.mubr.f32.mxu1 %v9631_v1 }
 0x657   : > { %7529 = vmatprep.subr.mxu1 %v7293_v62 }
 0x65d   : > { %7520 = vmatmul.mubr.f32.vlgmr.msra.gmra.mrb[0].mxu1 %v7282_v7 }
 0x65e   : > { %7533 = vmatpush1.msra.mxu1 %v7299_v10  ;;  %7596 = vmatprep.mubr.f32.mxu1 %v9631_v1 }
 0x65f   : > { %7605 = vmatprep.subr.mxu1 %v7213_v56  ;;  %v8275_v56 = vand.u32 4294901760, %v8274_v55 }
 0x665   : > { %7598 = vmatmul.mubr.f32.vlgmr.msra.gmra.mrb[0].mxu1 %v7280_v60 }
 0x666   : > { %7607 = vmatpush1.msra.mxu1 %v7215_v61  ;;  %7670 = vmatprep.mubr.f32.mxu1 %v9631_v1  ;;  %v8674_v61 = vpop.permute.xlu0 %8673 }
 0x667   : > { %7705 = vmatprep.subr.mxu1 %v7704_v26 }
 0x66d   : > { %7672 = vmatmul.mubr.f32.vlgmr.msra.gmra.mrb[0].mxu1 %v7280_v60  ;;  %v8672_v60 = vpop.permute.xlu1 %8671 }
 0x66e   : > { %7707 = vmatpush1.msra.mxu1 %v7706_v35  ;;  %7770 = vmatprep.mubr.f32.mxu1 %v9631_v1  ;;  %v8676_v62 = vsel %vm272_vm1, %v8672_v60, %v8674_v61 }
 0x66f   : > { %7787 = vmatprep.subr.mxu1 %v7786_v44  ;;  %v8682_v0 = vsel %vm297_vm3, %v8676_v62, 0 }
 0x670   : > { %v8684_v7 = vand.u32 4294901760, %v8682_v0 }
 0x671   : > { %v8670_v3 = vpop.permute.xlu1 %8669 }
 0x672   : > { %v8675_v10 = vsel %vm272_vm1, %v8670_v3, %v8672_v60  ;;  %v8763_v12 = vsub.f32 %v8682_v0, %v8684_v7 }
 0x673   : > { %v8680_v14 = vsel %vm297_vm3, %v8675_v10, 0 }
 0x674   : > { %v8686_v17 = vand.u32 4294901760, %v8680_v14  ;;  %v8764_v18 = vand.u32 4294901760, %v8763_v12 }
 0x675   : > { %7776 = vmatmul.mubr.f32.vlgmr.msra.gmra.mrb[0].mxu1 %v7775_v43 }
 0x676   : > { %7793 = vmatpush1.msra.mxu1 %v7792_v46  ;;  %7856 = vmatprep.mubr.f32.mxu1 %v9631_v1  ;;  %v8769_v20 = vsub.f32 %v8680_v14, %v8686_v17  ;;  %v8765_v21 = vsub.f32 %v8763_v12, %v8764_v18 }
 0x677   : > { %7866 = vmatprep.subr.mxu1 %v7783_v31  ;;  %v8755_v31 = vand.u32 4294901760, %v8754_v29 }
 0x678   : > { %v8770_v25 = vand.u32 4294901760, %v8769_v20 }
 0x67a   : > { %v8771_v9 = vsub.f32 %v8769_v20, %v8770_v25 }
 0x67c   : > { %v8772_v32 = vand.u32 4294901760, %v8771_v9 }
 0x67d   : > { %7858 = vmatmul.mubr.f32.vlgmr.msra.gmra.mrb[0].mxu1 %v7771_v34 }
 0x67e   : > { %7869 = vmatpush1.msra.mxu1 %v7789_v38  ;;  %7932 = vmatprep.mubr.f32.mxu1 %v9631_v1 }
 0x67f   : > { %7942 = vmatprep.subr.mxu1 %v7704_v26 }
 0x685   : > { %7935 = vmatmul.mubr.f32.vlgmr.msra.gmra.mrb[0].mxu1 %v7772_v37 }
 0x686   : > { %7944 = vmatpush1.msra.mxu1 %v7706_v35  ;;  %8007 = vmatprep.mubr.f32.mxu1 %v9631_v1 }
 0x687   : > { %8020 = vmatprep.subr.mxu1 %v7784_v36 }
 0x68d   : > { %8011 = vmatmul.mubr.f32.vlgmr.msra.gmra.mrb[0].mxu1 %v7773_v40 }
 0x68e   : > { %8024 = vmatpush1.msra.mxu1 %v7790_v42  ;;  %8087 = vmatprep.mubr.f32.mxu1 %v9631_v1 }
 0x68f   : > { %8096 = vmatprep.subr.mxu1 %v7704_v26  ;;  %v8766_v26 = vand.u32 4294901760, %v8765_v21 }
 0x695   : > { %8089 = vmatmul.mubr.f32.vlgmr.msra.gmra.mrb[0].mxu1 %v7771_v34 }
 0x696   : > { %8098 = vmatpush1.msra.mxu1 %v7706_v35  ;;  %8161 = vmatprep.mubr.f32.mxu1 %v9631_v1 }
 0x697   : > { %8194 = vmatprep.subr.mxu1 %v8193_v2 }
 0x69d   : > { %8163 = vmatmul.mubr.f32.vlgmr.msra.gmra.mrb[0].mxu1 %v7771_v34  ;;  %v9155_v34 = vpop.permute.xlu0 %9154 }
 0x69e   : > { %8196 = vmatpush1.msra.mxu1 %v8195_v53  ;;  %8259 = vmatprep.mubr.f32.mxu1 %v9631_v1 }
 0x69f   : > { %8276 = vmatprep.subr.mxu1 %v8275_v56 }
 0x6a5   : > { %8265 = vmatmul.mubr.f32.vlgmr.msra.gmra.mrb[0].mxu1 %v8264_v59 }
 0x6a6   : > { %8282 = vmatpush1.msra.mxu1 %v8281_v57  ;;  %8345 = vmatprep.mubr.f32.mxu1 %v9631_v1 }
 0x6a7   : > { %8355 = vmatprep.subr.mxu1 %v8272_v16 }
 0x6ad   : > { %8347 = vmatmul.mubr.f32.vlgmr.msra.gmra.mrb[0].mxu1 %v8260_v52 }
 0x6ae   : > { %8358 = vmatpush1.msra.mxu1 %v8278_v27  ;;  %8421 = vmatprep.mubr.f32.mxu1 %v9631_v1 }
 0x6af   : > { %8431 = vmatprep.subr.mxu1 %v8193_v2 }
 0x6b5   : > { %8424 = vmatmul.mubr.f32.vlgmr.msra.gmra.mrb[0].mxu1 %v8261_v13 }
 0x6b6   : > { %8433 = vmatpush1.msra.mxu1 %v8195_v53  ;;  %8496 = vmatprep.mubr.f32.mxu1 %v9631_v1 }
 0x6b7   : > { %8509 = vmatprep.subr.mxu1 %v8273_v63 }
 0x6bd   : > { %8500 = vmatmul.mubr.f32.vlgmr.msra.gmra.mrb[0].mxu1 %v8262_v54 }
 0x6be   : > { %8513 = vmatpush1.msra.mxu1 %v8279_v28  ;;  %8576 = vmatprep.mubr.f32.mxu1 %v9631_v1 }
 0x6bf   : > { %8585 = vmatprep.subr.mxu1 %v8193_v2 }
 0x6c5   : > { %8578 = vmatmul.mubr.f32.vlgmr.msra.gmra.mrb[0].mxu1 %v8260_v52 }
 0x6c6   : > { %8587 = vmatpush1.msra.mxu1 %v8195_v53  ;;  %8650 = vmatprep.mubr.f32.mxu1 %v9631_v1 }
 0x6c7   : > { %8685 = vmatprep.subr.mxu1 %v8684_v7 }
 0x6cd   : > { %8652 = vmatmul.mubr.f32.vlgmr.msra.gmra.mrb[0].mxu1 %v8260_v52 }
 0x6ce   : > { %8687 = vmatpush1.msra.mxu1 %v8686_v17  ;;  %8750 = vmatprep.mubr.f32.mxu1 %v9631_v1 }
 0x6cf   : > { %8767 = vmatprep.subr.mxu1 %v8766_v26 }
 0x6d5   : > { %8756 = vmatmul.mubr.f32.vlgmr.msra.gmra.mrb[0].mxu1 %v8755_v31 }
 0x6d6   : > { %8773 = vmatpush1.msra.mxu1 %v8772_v32  ;;  %8836 = vmatprep.mubr.f32.mxu1 %v9631_v1 }
 0x6d7   : > { %8846 = vmatprep.subr.mxu1 %v8763_v12 }
 0x6dd   : > { %8838 = vmatmul.mubr.f32.vlgmr.msra.gmra.mrb[0].mxu1 %v8751_v15 }
 0x6de   : > { %8849 = vmatpush1.msra.mxu1 %v8769_v20  ;;  %8912 = vmatprep.mubr.f32.mxu1 %v9631_v1 }
 0x6df   : > { %8922 = vmatprep.subr.mxu1 %v8684_v7 }
 0x6e5   : > { %8915 = vmatmul.mubr.f32.vlgmr.msra.gmra.mrb[0].mxu1 %v8752_v19 }
 0x6e6   : > { %8924 = vmatpush1.msra.mxu1 %v8686_v17  ;;  %8987 = vmatprep.mubr.f32.mxu1 %v9631_v1 }
 0x6e7   : > { %9000 = vmatprep.subr.mxu1 %v8764_v18 }
 0x6ed   : > { %8991 = vmatmul.mubr.f32.vlgmr.msra.gmra.mrb[0].mxu1 %v8753_v24 }
 0x6ee   : > { %9004 = vmatpush1.msra.mxu1 %v8770_v25  ;;  %9067 = vmatprep.mubr.f32.mxu1 %v9631_v1 }
 0x6ef   : > { %9076 = vmatprep.subr.mxu1 %v8684_v7 }
 0x6f5   : > { %9069 = vmatmul.mubr.f32.vlgmr.msra.gmra.mrb[0].mxu1 %v8751_v15 }
 0x6f6   : > { %9078 = vmatpush1.msra.mxu1 %v8686_v17  ;;  %9141 = vmatprep.mubr.f32.mxu1 %v9631_v1 }
 0x6fd   : > { %9143 = vmatmul.mubr.f32.vlgmr.msra.gmra.mrb[0].mxu1 %v8751_v15 }
 0x7d0   : > { %v9144_v35 = vpop.f32.mrb[0].mxu1 }
 0x7d1   : > { %v9157_v36 = vadd.f32 %v9155_v34, %v9144_v35  ;;  %v9146_v37 = vpop.f32.mrb[1].mxu1 }
 0x7d2   : > { %v9158_v38 = vadd.f32 %v9155_v34, %v9146_v37 }
 0x7d3   : > { %v9159_v39 = vsel %vm297_vm3, %v9157_v36, 0.0 }
 0x7d4   : > { %v9160_v40 = vsel %vm297_vm3, %v9158_v38, 0.0 }
 0x7d5   : > { %v9161_v42 = vadd.f32 %v9160_v40, %v9159_v39 }
 0x7d7   : > { %9162 = vadd.xlane.f32.xlu1 %v9161_v42 }
 0x864   : > { %v9163_v44 = vpop.xlane.xlu1 %9162 }
 0x865   : > { %v9164_v45 = vmul.f32 0.00390625, %v9163_v44 }
 0x867   : > { %v9165_v22 = vsub.f32 %v9157_v36, %v9164_v45  ;;  %v9166_v43 = vsub.f32 %v9158_v38, %v9164_v45 }
 0x869   : > { %v9167_v46 = vmul.f32 %v9165_v22, %v9165_v22  ;;  %v9168_v23 = vmul.f32 %v9166_v43, %v9166_v43 }
 0x86b   : > { %v9169_v1 = vsel %vm297_vm3, %v9167_v46, 0.0  ;;  %v9170_v47 = vsel %vm297_vm3, %v9168_v23, 0.0 }
 0x86c   : > { %v9171_v51 = vadd.f32 %v9170_v47, %v9169_v1 }
 0x86e   : > { %9172 = vadd.xlane.f32.xlu0 %v9171_v51 }
 0x8fb   : > { %v9173_v48 = vpop.xlane.xlu0 %9172 }
 0x8fc   : > { %v9174_v49 = vmul.f32 0.00390625, %v9173_v48 }
 0x8fe   : > { %v9175_v50 = vadd.f32 1e-05, %v9174_v49 }
 0x900   : > { %9564 = vrsqrt.f32 %v9175_v50 }
 0x90a   : > { %v9565_v2 = vpop.eup %9564 }
 0x90b   : > { %v9177_v4 = vmul.f32 %v9565_v2, %v9165_v22  ;;  %v9178_v41 = vmul.f32 %v9565_v2, %v9166_v43 }
 0x90d   : > { %v9182_v5 = vadd.f32 %v9177_v4, %v9737_v8  ;;  %v9183_v16 = vadd.f32 %v9178_v41, %v9908_v33 }
 0x90f   : > { %v9184_v52 = vmax.f32 %v9182_v5, 0.0  ;;  %v9185_v53 = vmax.f32 %v9183_v16, 0.0 }
 0x911   : > { %v9188_v63 = vcombine.low %v9184_v52, %v9185_v53 }
 0x913   : > { %9190 = vst [vmem:[%s244_s17] sm:$0xff] %v9188_v63 }
 0x914   : > { %9580 = shalt.err (!%p9577_p3)
}
 0x915   : > { %s9581_s20 = scalar_lea.hbm %s10215_s12, 128  ;;  %s9585_s10 = scalar_lea.hbm %s10263_s6, 256 }
 0x916   : > { %p9582_p4 = scmp.ne.s32.totalorder %s10215_s12, %s9581_s20  ;;  %p9586_p9 = scmp.lt.u32.totalorder %s10215_s12, %s10263_s6 }
 0x917   : > { %p9587_p10 = scmp.lt.u32.totalorder %s9585_s10, %s9581_s20  ;;  %p9589_p12 = scmp.lt.u32.totalorder %s9581_s20, %s10215_s12 }
 0x918   : > { %p9583_p7 = pnand %p9582_p4, %p9715_p5 }
 0x919   : > { %p9588_p11 = por %p9587_p10, %p9586_p9 }
 0x91a   : > { %p9584_p8 = pneg %p9583_p7 }
 0x91b   : > { %p9590_p13 = por %p9589_p12, %p9588_p11 }
 0x91d   : > { %p9591_p0 = pnand %p9590_p13, %p9584_p8 }
 0x91f   : > { %9594 = shalt.err (!%p9591_p0)
}
 0x920   : > { %9508 = dma.vmem_to_hbm [thread:$0]  (%p9715_p5), %s10217_s18, 128, %s10215_s12, %s9192_s14  }
 0x921 PF: > { %p9514_p1 = scmp.ge.s32.totalorder %s9629_s24, 2  ;;  %s9218_s17 = sand.u32 1, %s9617_s21  }
 0x922   : > { %s9219_s28 = scalar_lea.sflag [#allocation4], %s9218_s17 }
 0x923   : > { %p9511_p2 = pnand %p9514_p1, %p9719_p6 }
 0x925   : > { %9612 = dma.done.wait (!%p9511_p2), %s9219_s28, 128  }
 0x926   : > { %9614 = vsyncadd (!%p9511_p2), %s9219_s28, 4294967168  ;;  %p16_p3 = scmp.ge.s32.totalorder %s9702_s27, 4   ;;  %s10266_s21 = smov %s9621_s22 }
 0x927   : > { %s10267_s22 = smov %s9625_s23  ;;  %s10268_s23 = smov %s9713_s30 }
 0x928   : > { %s10269_s24 = smov %s9702_s27  ;;  %18 = sbr.rel (!%p16_p3) target bundleno = 3 (0x3), region = 96 }
 0x92f   :  { %9224 = vsyncpa [#allocation4], 1 }
 0x930   :  { %9226 = vsyncpa [#allocation4 + $0x1], 1 }

</bundles_post_ra>
